<compile_context>
chip_gen: v7x
topology: tpu7x:2x2x1
jax: 0.10.0
libtpu: 0.0.40
codegen_flags: <defaults>
</compile_context>

<pallas_src>
import functools

import jax
import jax.numpy as jnp
import numpy as np
from jax import lax
from jax.experimental import pallas as pl
from jax.experimental.pallas import tpu as pltpu

LANE = 128          # TPU vreg lane width
TILE_M_MAX = 512    # im2col rows per grid step (~85% of HBM roofline territory)
TILE_N_MAX = 256    # output channels per grid step (v6e/v7x MXU is 256 wide)
TILE_K_MAX = 2048   # contraction depth kept resident before K-tiling kicks in


def _round_up(x, m):
    return ((x + m - 1) // m) * m


def _pick_tile_m(M):
    if M >= TILE_M_MAX:
        return TILE_M_MAX
    if M % 8 == 0 or M < 8:
        return M
    return (M // 8) * 8


# ----------------------------- Pallas kernels -----------------------------
# grid = (m_blocks, n_blocks, k_blocks); K (reduction) is last + "arbitrary".

def _mm_bias_act_kernel(p_ref, w_ref, b_ref, o_ref, acc_ref, *, relu):
    @pl.when(pl.program_id(2) == 0)
    def _():
        acc_ref[...] = jnp.zeros_like(acc_ref)

    acc_ref[...] += jnp.dot(p_ref[...], w_ref[...],
                            preferred_element_type=jnp.float32)

    @pl.when(pl.program_id(2) == pl.num_programs(2) - 1)
    def _():
        out = acc_ref[...] + b_ref[...]
        if relu:
            out = jnp.maximum(out, 0.0)
        o_ref[...] = out.astype(o_ref.dtype)


def _mm_bias_add_act_kernel(p_ref, w_ref, b_ref, r_ref, o_ref, acc_ref, *, relu):
    # same as above, fused with the residual add (conv2 + shortcut + ReLU)
    @pl.when(pl.program_id(2) == 0)
    def _():
        acc_ref[...] = jnp.zeros_like(acc_ref)

    acc_ref[...] += jnp.dot(p_ref[...], w_ref[...],
                            preferred_element_type=jnp.float32)

    @pl.when(pl.program_id(2) == pl.num_programs(2) - 1)
    def _():
        out = acc_ref[...] + b_ref[...] + r_ref[...].astype(jnp.float32)
        if relu:
            out = jnp.maximum(out, 0.0)
        o_ref[...] = out.astype(o_ref.dtype)


def _matmul_bias_act(patches, wmat, bias, residual=None, *, relu,
                     out_dtype=jnp.float32, slice_cols=True):
    """act(patches @ wmat + bias (+ residual)).

    patches : [M, K]        (cast to bf16 here; f32 accumulation on the MXU)
    wmat    : [K, Cout]     folded-BN scale already multiplied into columns
    bias    : [Cout]        folded-BN bias (kept f32)
    residual: [M, >=Cout]   optional, added before the activation
    """
    M, K = patches.shape
    Cout = wmat.shape[1]

    # Lane-dense output: pad Cout to a multiple of 128. Padded weight columns /
    # bias entries are zero, so padded output columns are exactly 0.
    Cp = _round_up(Cout, LANE)

    # K-tiling only for very deep contractions (keeps v7x's 64 MiB VMEM safe).
    if K > TILE_K_MAX:
        tile_k = TILE_K_MAX
        Kp = _round_up(K, tile_k)
    else:
        tile_k = K
        Kp = K

    tile_m = _pick_tile_m(M)
    tile_n = TILE_N_MAX if Cp % TILE_N_MAX == 0 else LANE

    patches = patches.astype(jnp.bfloat16)
    if Kp != K:
        patches = jnp.pad(patches, ((0, 0), (0, Kp - K)))
    wmat = jnp.pad(wmat.astype(jnp.bfloat16), ((0, Kp - K), (0, Cp - Cout)))
    bias = jnp.pad(bias.astype(jnp.float32), (0, Cp - Cout)).reshape(1, Cp)

    nm = pl.cdiv(M, tile_m)
    nn = Cp // tile_n
    nk = Kp // tile_k

    in_specs = [
        pl.BlockSpec((tile_m, tile_k), lambda i, j, k: (i, k)),
        pl.BlockSpec((tile_k, tile_n), lambda i, j, k: (k, j)),
        pl.BlockSpec((1, tile_n), lambda i, j, k: (0, j)),
    ]
    args = [patches, wmat, bias]
    if residual is not None:
        if residual.shape[1] < Cp:
            residual = jnp.pad(residual, ((0, 0), (0, Cp - residual.shape[1])))
        residual = residual.astype(jnp.bfloat16)
        in_specs.append(pl.BlockSpec((tile_m, tile_n), lambda i, j, k: (i, j)))
        args.append(residual)
        kernel = functools.partial(_mm_bias_add_act_kernel, relu=relu)
    else:
        kernel = functools.partial(_mm_bias_act_kernel, relu=relu)

    out_itemsize = jnp.dtype(out_dtype).itemsize
    bytes_accessed = (patches.size * 2 + wmat.size * 2 + bias.size * 4
                      + (residual.size * 2 if residual is not None else 0)
                      + M * Cp * out_itemsize)
    cost = pl.CostEstimate(flops=2 * M * Kp * Cp, transcendentals=0,
                           bytes_accessed=int(bytes_accessed))

    # double-buffered tiles + f32 accumulator, with generous headroom, capped
    # comfortably below v7x's 64 MiB physical VMEM.
    vmem_bytes = (2 * (tile_m * tile_k * 2 + tile_k * tile_n * 2 + tile_n * 4
                       + tile_m * tile_n * 2 + tile_m * tile_n * out_itemsize)
                  + tile_m * tile_n * 4)
    vmem_limit = int(min(max(4 * vmem_bytes, 32 * 1024 * 1024),
                         56 * 1024 * 1024))

    out = pl.pallas_call(
        kernel,
        out_shape=jax.ShapeDtypeStruct((M, Cp), out_dtype),
        grid=(nm, nn, nk),
        in_specs=in_specs,
        out_specs=pl.BlockSpec((tile_m, tile_n), lambda i, j, k: (i, j)),
        scratch_shapes=[pltpu.VMEM((tile_m, tile_n), jnp.float32)],
        compiler_params=pltpu.CompilerParams(
            dimension_semantics=("parallel", "parallel", "arbitrary"),
            vmem_limit_bytes=vmem_limit),
        cost_estimate=cost,
    )(*args)
    return out[:, :Cout] if slice_cols else out


# ------------------------------- JAX glue ---------------------------------

def _im2col(x_nhwc, ksize, stride, padding):
    """x: [N,H,W,C] -> patches [N*Ho*Wo, ksize*ksize*C], (Ho, Wo)."""
    N, H, W, C = x_nhwc.shape
    xp = jnp.pad(x_nhwc, ((0, 0), (padding, padding), (padding, padding), (0, 0)))
    Ho = (H + 2 * padding - ksize) // stride + 1
    Wo = (W + 2 * padding - ksize) // stride + 1
    cols = []
    for kh in range(ksize):
        for kw in range(ksize):
            cols.append(xp[:, kh:kh + stride * Ho:stride, kw:kw + stride * Wo:stride, :])
    patches = jnp.concatenate(cols, axis=-1)
    return patches.reshape(N * Ho * Wo, ksize * ksize * C), (Ho, Wo)


def _fold_bn(gamma, beta, mean, var, eps=1e-5):
    scale = gamma / jnp.sqrt(var + eps)
    bias = beta - mean * scale
    return scale, bias


def _folded_weight(w_oihw, scale):
    """[Cout,Cin,kh,kw] -> [kh*kw*Cin, Cout] (im2col order), with the BN scale
    folded into the output-channel columns so the kernel epilogue is bias-only."""
    cout, cin, kh, kw = w_oihw.shape
    wmat = jnp.transpose(w_oihw, (2, 3, 1, 0)).reshape(kh * kw * cin, cout)
    return wmat * scale.reshape(1, cout)


def basic_block_forward_nhwc(x_nhwc, params, stride):
    """BasicBlock forward on NHWC activations (keep NHWC across consecutive
    blocks; only the NCHW wrapper below transposes at the PyTorch boundary)."""
    planes = params["conv1_w"].shape[0]
    N, H, W, Cin = x_nhwc.shape
    x = x_nhwc.astype(jnp.bfloat16)          # bf16 operands, f32 accumulation

    # conv1 (3x3, stride, pad 1) + BN1 + ReLU -> bf16 intermediate
    s1, b1 = _fold_bn(*params["bn1"])
    p1, (Ho, Wo) = _im2col(x, 3, stride, 1)
    out1 = _matmul_bias_act(p1, _folded_weight(params["conv1_w"], s1), b1,
                            relu=True, out_dtype=jnp.bfloat16)
    out1 = out1.reshape(N, Ho, Wo, planes)

    # shortcut (identity, or 1x1-conv + BN projection), kept bf16 / lane-padded
    if stride != 1 or Cin != planes:
        ssc, bsc = _fold_bn(*params["bn_sc"])
        psc, _ = _im2col(x, 1, stride, 0)
        sc = _matmul_bias_act(psc, _folded_weight(params["sc_w"], ssc), bsc,
                              relu=False, out_dtype=jnp.bfloat16,
                              slice_cols=False)
    else:
        sc = x.reshape(N * H * W, Cin)

    # conv2 (3x3, stride 1, pad 1) + BN2 + residual add + ReLU, fully fused
    s2, b2 = _fold_bn(*params["bn2"])
    p2, _ = _im2col(out1, 3, 1, 1)
    out2 = _matmul_bias_act(p2, _folded_weight(params["conv2_w"], s2), b2,
                            residual=sc, relu=True, out_dtype=jnp.float32)
    return out2.reshape(N, Ho, Wo, planes)


def basic_block_forward(x_nchw, params, stride):
    """PyTorch-convention entry: [N, Cin, H, W] -> [N, planes, Ho, Wo]."""
    x = jnp.transpose(x_nchw, (0, 2, 3, 1))
    y = basic_block_forward_nhwc(x, params, stride)
    return jnp.transpose(y, (0, 3, 1, 2))


# ----------------------- deterministic parameter init ---------------------

def init_basic_block_params(key, in_planes, planes, stride):
    ks = jax.random.split(key, 6)

    def conv_w(k, cout, cin, kh, kw):
        fan = cin * kh * kw
        return jax.random.normal(k, (cout, cin, kh, kw), jnp.float32) / np.sqrt(fan)

    def bn_p(k, c):
        k1, k2, k3, k4 = jax.random.split(k, 4)
        gamma = 1.0 + 0.1 * jax.random.normal(k1, (c,), jnp.float32)
        beta = 0.1 * jax.random.normal(k2, (c,), jnp.float32)
        mean = 0.1 * jax.random.normal(k3, (c,), jnp.float32)
        var = jax.random.uniform(k4, (c,), jnp.float32, minval=0.5, maxval=1.5)
        return gamma, beta, mean, var

    params = {
        "conv1_w": conv_w(ks[0], planes, in_planes, 3, 3),
        "bn1": bn_p(ks[1], planes),
        "conv2_w": conv_w(ks[2], planes, planes, 3, 3),
        "bn2": bn_p(ks[3], planes),
    }
    if stride != 1 or in_planes != planes:
        params["sc_w"] = conv_w(ks[4], planes, in_planes, 1, 1)
        params["bn_sc"] = bn_p(ks[5], planes)
    return params


# ------------------------------ pure-JAX ref -------------------------------

def _ref_conv_bn(x, w, bn, stride, pad, relu):
    y = lax.conv_general_dilated(
        x, w, (stride, stride), [(pad, pad), (pad, pad)],
        dimension_numbers=("NCHW", "OIHW", "NCHW"))
    g, b, m, v = bn
    scale = (g / jnp.sqrt(v + 1e-5)).reshape(1, -1, 1, 1)
    bias = (b - m * g / jnp.sqrt(v + 1e-5)).reshape(1, -1, 1, 1)
    y = y * scale + bias
    return jnp.maximum(y, 0.0) if relu else y


def ref_basic_block(x, params, stride):
    planes = params["conv1_w"].shape[0]
    in_planes = x.shape[1]
    out = _ref_conv_bn(x, params["conv1_w"], params["bn1"], stride, 1, True)
    out = _ref_conv_bn(out, params["conv2_w"], params["bn2"], 1, 1, False)
    if stride != 1 or in_planes != planes:
        sc = _ref_conv_bn(x, params["sc_w"], params["bn_sc"], stride, 0, False)
    else:
        sc = x
    return jnp.maximum(out + sc, 0.0)


# ---------------------------------- main -----------------------------------

if __name__ == "__main__":
    key = jax.random.PRNGKey(0)
    kx, kp1, kp2 = jax.random.split(key, 3)

    fwd = jax.jit(basic_block_forward, static_argnums=(2,))

    # Case 1: identity shortcut (stride=1, in_planes == planes)
    x = jax.random.normal(kx, (2, 4, 16, 16), jnp.float32)
    params = init_basic_block_params(kp1, in_planes=4, planes=4, stride=1)
    y = jax.block_until_ready(fwd(x, params, 1))
    y_ref = ref_basic_block(x, params, 1)
    # bf16 operands with f32 accumulation -> ~2e-2 tolerance vs. f32 reference
    np.testing.assert_allclose(np.asarray(y), np.asarray(y_ref), rtol=2e-2, atol=2e-2)

    # Case 2: projection shortcut (stride=2, channel expansion 4 -> 8)
    params2 = init_basic_block_params(kp2, in_planes=4, planes=8, stride=2)
    y2 = jax.block_until_ready(fwd(x, params2, 2))
    y2_ref = ref_basic_block(x, params2, 2)
    np.testing.assert_allclose(np.asarray(y2), np.asarray(y2_ref), rtol=2e-2, atol=2e-2)

    print("KERNEL_OK")
</pallas_src>

<mosaic_0001>
module attributes {stable_mosaic.version = 11 : i64} {
  func.func @_mm_bias_act_kernel(%arg0: i32, %arg1: i32, %arg2: i32, %arg3: memref<512x36xbf16, #tpu.memory_space<vmem>>, %arg4: memref<36x128xbf16, #tpu.memory_space<vmem>>, %arg5: memref<1x128xf32, #tpu.memory_space<vmem>>, %arg6: memref<512x128xbf16, #tpu.memory_space<vmem>>, %arg7: memref<512x128xf32, #tpu.memory_space<vmem>>) attributes {dimension_semantics = [#tpu.dimension_semantics<parallel>, #tpu.dimension_semantics<parallel>, #tpu.dimension_semantics<arbitrary>], iteration_bounds = array<i64: 1, 1, 1>, scalar_prefetch = 0 : i64, scratch_operands = 1 : i64, tpu.core_type = #tpu.core_type<tc>, window_params = [{transform_indices = @transform_0, window_bounds = array<i64: 512, 36>}, {transform_indices = @transform_1, window_bounds = array<i64: 36, 128>}, {transform_indices = @transform_2, window_bounds = array<i64: 1, 128>}, {transform_indices = @transform_3, window_bounds = array<i64: 512, 128>}]} {
    %c0_i32 = arith.constant 0 : i32
    %0 = arith.cmpi eq, %arg2, %c0_i32 : i32
    %1 = arith.extui %0 : i1 to i32
    %c0_i32_0 = arith.constant 0 : i32
    %2 = arith.cmpi ne, %1, %c0_i32_0 : i32
    scf.if %2 {
      %cst_10 = arith.constant 0.000000e+00 : f32
      %12 = vector.broadcast %cst_10 : f32 to vector<512x128xf32>
      %c0_11 = arith.constant 0 : index
      %c0_12 = arith.constant 0 : index
      %13 = vector.load %arg7[%c0_11, %c0_12] : memref<512x128xf32, #tpu.memory_space<vmem>>, vector<512x128xf32>
      tpu.vector_store %arg7[%c0_11, %c0_12], %12 {strides = array<i32>} : memref<512x128xf32, #tpu.memory_space<vmem>>, vector<512x128xf32>,
    } else {
    }
    %c0 = arith.constant 0 : index
    %c0_1 = arith.constant 0 : index
    %3 = vector.load %arg7[%c0, %c0_1] : memref<512x128xf32, #tpu.memory_space<vmem>>, vector<512x128xf32>
    %c0_2 = arith.constant 0 : index
    %c0_3 = arith.constant 0 : index
    %4 = vector.load %arg3[%c0_2, %c0_3] : memref<512x36xbf16, #tpu.memory_space<vmem>>, vector<512x36xbf16>
    %c0_4 = arith.constant 0 : index
    %c0_5 = arith.constant 0 : index
    %5 = vector.load %arg4[%c0_4, %c0_5] : memref<36x128xbf16, #tpu.memory_space<vmem>>, vector<36x128xbf16>
    %cst = arith.constant dense<0.000000e+00> : vector<512x128xf32>
    %6 = tpu.matmul %4, %5, %cst {dimension_numbers = #tpu.dot_dimension_numbers<[1], [0], [0], [1], [0, 0, 1, 1], [], []>} : vector<512x36xbf16>, vector<36x128xbf16>, vector<512x128xf32> -> vector<512x128xf32>
    %7 = arith.addf %3, %6 : vector<512x128xf32>
    %c0_6 = arith.constant 0 : index
    %c0_7 = arith.constant 0 : index
    %8 = vector.load %arg7[%c0_6, %c0_7] : memref<512x128xf32, #tpu.memory_space<vmem>>, vector<512x128xf32>
    tpu.vector_store %arg7[%c0_6, %c0_7], %7 {strides = array<i32>} : memref<512x128xf32, #tpu.memory_space<vmem>>, vector<512x128xf32>,
    %c0_i32_8 = arith.constant 0 : i32
    %9 = arith.cmpi eq, %arg2, %c0_i32_8 : i32
    %10 = arith.extui %9 : i1 to i32
    %c0_i32_9 = arith.constant 0 : i32
    %11 = arith.cmpi ne, %10, %c0_i32_9 : i32
    scf.if %11 {
      %c0_10 = arith.constant 0 : index
      %c0_11 = arith.constant 0 : index
      %12 = vector.load %arg7[%c0_10, %c0_11] : memref<512x128xf32, #tpu.memory_space<vmem>>, vector<512x128xf32>
      %c0_12 = arith.constant 0 : index
      %c0_13 = arith.constant 0 : index
      %13 = vector.load %arg5[%c0_12, %c0_13] : memref<1x128xf32, #tpu.memory_space<vmem>>, vector<1x128xf32>
      %14 = vector.broadcast %13 : vector<1x128xf32> to vector<512x128xf32>
      %15 = arith.addf %12, %14 : vector<512x128xf32>
      %cst_14 = arith.constant 0.000000e+00 : f32
      %16 = vector.broadcast %cst_14 : f32 to vector<512x128xf32>
      %17 = arith.maximumf %15, %16 : vector<512x128xf32>
      %18 = arith.truncf %17 : vector<512x128xf32> to vector<512x128xbf16>
      %c0_15 = arith.constant 0 : index
      %c0_16 = arith.constant 0 : index
      %19 = vector.load %arg6[%c0_15, %c0_16] : memref<512x128xbf16, #tpu.memory_space<vmem>>, vector<512x128xbf16>
      tpu.vector_store %arg6[%c0_15, %c0_16], %18 {strides = array<i32>} : memref<512x128xbf16, #tpu.memory_space<vmem>>, vector<512x128xbf16>,
    } else {
    }
    return
  }
  func.func @transform_0(%arg0: i32, %arg1: i32, %arg2: i32) -> (i32, i32) {
    %c0_i32 = arith.constant 0 : i32
    return %arg0, %arg2 : i32, i32
  }
  func.func @transform_1(%arg0: i32, %arg1: i32, %arg2: i32) -> (i32, i32) {
    %c0_i32 = arith.constant 0 : i32
    return %arg2, %arg1 : i32, i32
  }
  func.func @transform_2(%arg0: i32, %arg1: i32, %arg2: i32) -> (i32, i32) {
    %c0_i32 = arith.constant 0 : i32
    %c0_i32_0 = arith.constant 0 : i32
    return %c0_i32, %arg1 : i32, i32
  }
  func.func @transform_3(%arg0: i32, %arg1: i32, %arg2: i32) -> (i32, i32) {
    %c0_i32 = arith.constant 0 : i32
    return %arg0, %arg1 : i32, i32
  }
}

module attributes {stable_mosaic.version = 11 : i64} {
  func.func @_mm_bias_add_act_kernel(%arg0: i32, %arg1: i32, %arg2: i32, %arg3: memref<512x36xbf16, #tpu.memory_space<vmem>>, %arg4: memref<36x128xbf16, #tpu.memory_space<vmem>>, %arg5: memref<1x128xf32, #tpu.memory_space<vmem>>, %arg6: memref<512x128xbf16, #tpu.memory_space<vmem>>, %arg7: memref<512x128xf32, #tpu.memory_space<vmem>>, %arg8: memref<512x128xf32, #tpu.memory_space<vmem>>) attributes {dimension_semantics = [#tpu.dimension_semantics<parallel>, #tpu.dimension_semantics<parallel>, #tpu.dimension_semantics<arbitrary>], iteration_bounds = array<i64: 1, 1, 1>, scalar_prefetch = 0 : i64, scratch_operands = 1 : i64, tpu.core_type = #tpu.core_type<tc>, window_params = [{transform_indices = @transform_0, window_bounds = array<i64: 512, 36>}, {transform_indices = @transform_1, window_bounds = array<i64: 36, 128>}, {transform_indices = @transform_2, window_bounds = array<i64: 1, 128>}, {transform_indices = @transform_3, window_bounds = array<i64: 512, 128>}, {transform_indices = @transform_4, window_bounds = array<i64: 512, 128>}]} {
    %c0_i32 = arith.constant 0 : i32
    %0 = arith.cmpi eq, %arg2, %c0_i32 : i32
    %1 = arith.extui %0 : i1 to i32
    %c0_i32_0 = arith.constant 0 : i32
    %2 = arith.cmpi ne, %1, %c0_i32_0 : i32
    scf.if %2 {
      %cst_10 = arith.constant 0.000000e+00 : f32
      %12 = vector.broadcast %cst_10 : f32 to vector<512x128xf32>
      %c0_11 = arith.constant 0 : index
      %c0_12 = arith.constant 0 : index
      %13 = vector.load %arg8[%c0_11, %c0_12] : memref<512x128xf32, #tpu.memory_space<vmem>>, vector<512x128xf32>
      tpu.vector_store %arg8[%c0_11, %c0_12], %12 {strides = array<i32>} : memref<512x128xf32, #tpu.memory_space<vmem>>, vector<512x128xf32>,
    } else {
    }
    %c0 = arith.constant 0 : index
    %c0_1 = arith.constant 0 : index
    %3 = vector.load %arg8[%c0, %c0_1] : memref<512x128xf32, #tpu.memory_space<vmem>>, vector<512x128xf32>
    %c0_2 = arith.constant 0 : index
    %c0_3 = arith.constant 0 : index
    %4 = vector.load %arg3[%c0_2, %c0_3] : memref<512x36xbf16, #tpu.memory_space<vmem>>, vector<512x36xbf16>
    %c0_4 = arith.constant 0 : index
    %c0_5 = arith.constant 0 : index
    %5 = vector.load %arg4[%c0_4, %c0_5] : memref<36x128xbf16, #tpu.memory_space<vmem>>, vector<36x128xbf16>
    %cst = arith.constant dense<0.000000e+00> : vector<512x128xf32>
    %6 = tpu.matmul %4, %5, %cst {dimension_numbers = #tpu.dot_dimension_numbers<[1], [0], [0], [1], [0, 0, 1, 1], [], []>} : vector<512x36xbf16>, vector<36x128xbf16>, vector<512x128xf32> -> vector<512x128xf32>
    %7 = arith.addf %3, %6 : vector<512x128xf32>
    %c0_6 = arith.constant 0 : index
    %c0_7 = arith.constant 0 : index
    %8 = vector.load %arg8[%c0_6, %c0_7] : memref<512x128xf32, #tpu.memory_space<vmem>>, vector<512x128xf32>
    tpu.vector_store %arg8[%c0_6, %c0_7], %7 {strides = array<i32>} : memref<512x128xf32, #tpu.memory_space<vmem>>, vector<512x128xf32>,
    %c0_i32_8 = arith.constant 0 : i32
    %9 = arith.cmpi eq, %arg2, %c0_i32_8 : i32
    %10 = arith.extui %9 : i1 to i32
    %c0_i32_9 = arith.constant 0 : i32
    %11 = arith.cmpi ne, %10, %c0_i32_9 : i32
    scf.if %11 {
      %c0_10 = arith.constant 0 : index
      %c0_11 = arith.constant 0 : index
      %12 = vector.load %arg8[%c0_10, %c0_11] : memref<512x128xf32, #tpu.memory_space<vmem>>, vector<512x128xf32>
      %c0_12 = arith.constant 0 : index
      %c0_13 = arith.constant 0 : index
      %13 = vector.load %arg5[%c0_12, %c0_13] : memref<1x128xf32, #tpu.memory_space<vmem>>, vector<1x128xf32>
      %14 = vector.broadcast %13 : vector<1x128xf32> to vector<512x128xf32>
      %15 = arith.addf %12, %14 : vector<512x128xf32>
      %c0_14 = arith.constant 0 : index
      %c0_15 = arith.constant 0 : index
      %16 = vector.load %arg6[%c0_14, %c0_15] : memref<512x128xbf16, #tpu.memory_space<vmem>>, vector<512x128xbf16>
      %17 = arith.extf %16 : vector<512x128xbf16> to vector<512x128xf32>
      %18 = arith.addf %15, %17 : vector<512x128xf32>
      %cst_16 = arith.constant 0.000000e+00 : f32
      %19 = vector.broadcast %cst_16 : f32 to vector<512x128xf32>
      %20 = arith.maximumf %18, %19 : vector<512x128xf32>
      %c0_17 = arith.constant 0 : index
      %c0_18 = arith.constant 0 : index
      %21 = vector.load %arg7[%c0_17, %c0_18] : memref<512x128xf32, #tpu.memory_space<vmem>>, vector<512x128xf32>
      tpu.vector_store %arg7[%c0_17, %c0_18], %20 {strides = array<i32>} : memref<512x128xf32, #tpu.memory_space<vmem>>, vector<512x128xf32>,
    } else {
    }
    return
  }
  func.func @transform_0(%arg0: i32, %arg1: i32, %arg2: i32) -> (i32, i32) {
    %c0_i32 = arith.constant 0 : i32
    return %arg0, %arg2 : i32, i32
  }
  func.func @transform_1(%arg0: i32, %arg1: i32, %arg2: i32) -> (i32, i32) {
    %c0_i32 = arith.constant 0 : i32
    return %arg2, %arg1 : i32, i32
  }
  func.func @transform_2(%arg0: i32, %arg1: i32, %arg2: i32) -> (i32, i32) {
    %c0_i32 = arith.constant 0 : i32
    %c0_i32_0 = arith.constant 0 : i32
    return %c0_i32, %arg1 : i32, i32
  }
  func.func @transform_3(%arg0: i32, %arg1: i32, %arg2: i32) -> (i32, i32) {
    %c0_i32 = arith.constant 0 : i32
    return %arg0, %arg1 : i32, i32
  }
  func.func @transform_4(%arg0: i32, %arg1: i32, %arg2: i32) -> (i32, i32) {
    %c0_i32 = arith.constant 0 : i32
    return %arg0, %arg1 : i32, i32
  }
}

</mosaic_0001>

<bundles_post_ra>
// kernel: basic_block_forward.2
= control target key start
LH: loop header
LB: loop body
LE: loop exit
PB: predicated region body
PF: predicated region fallthrough
CT: control target
= control target key end

     0   :  { %vm391_vm0 = vcmask 293888   ;;  %vm488_vm1 = vcmask 1041408   ;;  %s2292_s1 = inlined_call_operand.vmem [shape: bf16[36,128], index: 1, kind: input, shape index: {}]   ;;  %s2293_s0 = inlined_call_operand.vmem [shape: bf16[512,36], index: 0, kind: input, shape index: {}]   ;;  %s2294_s2 = inlined_call_operand.vmem [shape: f32[1,128], index: 2, kind: input, shape index: {}]   ;;  %s2295_s3 = inlined_call_operand.vmem [shape: bf16[512,128], index: 3, kind: output, shape index: {}]  }
   0x1   :  { %v1935_v0 = vld [vmem:[%s2292_s1] sm:$0xff]   ;;  %v1936_v1 = vld [vmem:[%s2292_s1 + $0x8] sm:$0xff]   ;;  %v1937_v2 = vld [vmem:[%s2292_s1 + $0x10] ss:$0 sps:$4 sm:$0x33]  }
   0x2   :  { %1857 = vmatprep.subr.bf16.mxu0 %v1935_v0  ;;  %1927 = vmatprep.subr.bf16.mxu1 %v1935_v0  ;;  %v1938_v3 = vld [vmem:[%s2293_s0] sm:$0xff]   ;;  %v490_v5 = vsel %vm488_vm1, %v1937_v2, 0  ;;  %v1940_v6 = vld [vmem:[%s2293_s0 + $0x8] sm:$0xff]   ;;  %v1942_v8 = vld [vmem:[%s2293_s0 + $0x10] sm:$0xff]  }
   0x3   :  { %1858 = vmatpush3.bf16.msra.mxu0 %v1935_v0  ;;  %1930 = vmatpush3.bf16.msra.mxu1 %v1935_v0  ;;  %v1939_v4 = vld [vmem:[%s2293_s0 + $0x80] sm:$0xff]   ;;  %v1941_v7 = vld [vmem:[%s2293_s0 + $0x88] sm:$0xff]   ;;  %v1943_v9 = vld [vmem:[%s2293_s0 + $0x90] sm:$0xff]  }
   0x4   :  { %1859 = vmatprep.subr.bf16.mxu0 %v1936_v1  ;;  %1928 = vmatprep.subr.bf16.mxu1 %v1936_v1  ;;  %v1944_v10 = vld [vmem:[%s2293_s0 + $0x18] sm:$0xff]   ;;  %v1946_v12 = vld [vmem:[%s2293_s0 + $0x20] sm:$0xff]   ;;  %v1948_v14 = vld [vmem:[%s2293_s0 + $0x28] sm:$0xff]  }
   0x5   :  { %1863 = vmatprep.mubr.msk.bf16.mxu0 %vm391_vm0, %v1938_v3  ;;  %1895 = vmatprep.mubr.msk.bf16.mxu1 %vm391_vm0, %v1939_v4  ;;  %v1945_v11 = vld [vmem:[%s2293_s0 + $0x98] sm:$0xff]   ;;  %v1947_v13 = vld [vmem:[%s2293_s0 + $0xa0] sm:$0xff]   ;;  %v1949_v15 = vld [vmem:[%s2293_s0 + $0xa8] sm:$0xff]  }
   0x6   :  { %v1950_v16 = vld [vmem:[%s2293_s0 + $0x30] sm:$0xff]   ;;  %v1952_v18 = vld [vmem:[%s2293_s0 + $0x38] sm:$0xff]   ;;  %v1954_v20 = vld [vmem:[%s2293_s0 + $0x40] sm:$0xff]  }
   0x7   :  { %1860 = vmatpush3.bf16.msra.mxu0 %v1936_v1  ;;  %1931 = vmatpush3.bf16.msra.mxu1 %v1936_v1  ;;  %v1951_v17 = vld [vmem:[%s2293_s0 + $0xb0] sm:$0xff]   ;;  %v1953_v19 = vld [vmem:[%s2293_s0 + $0xb8] sm:$0xff]   ;;  %v1955_v21 = vld [vmem:[%s2293_s0 + $0xc0] sm:$0xff]  }
   0x8   :  { %1933 = vmatprep.subr.msk.bf16.mxu0 %vm488_vm1, %v1937_v2  ;;  %1934 = vmatprep.subr.msk.bf16.mxu1 %vm488_vm1, %v1937_v2  ;;  %v1956_v22 = vld [vmem:[%s2293_s0 + $0x48] sm:$0xff]   ;;  %v1958_v24 = vld [vmem:[%s2293_s0 + $0x50] sm:$0xff]   ;;  %v1960_v26 = vld [vmem:[%s2293_s0 + $0x58] sm:$0xff]  }
   0x9   :  { %v1957_v23 = vld [vmem:[%s2293_s0 + $0xc8] sm:$0xff]   ;;  %v1959_v25 = vld [vmem:[%s2293_s0 + $0xd0] sm:$0xff]   ;;  %v1961_v27 = vld [vmem:[%s2293_s0 + $0xd8] sm:$0xff]  }
   0xa   :  { %v1962_v28 = vld [vmem:[%s2293_s0 + $0x60] sm:$0xff]   ;;  %v1964_v30 = vld [vmem:[%s2293_s0 + $0x68] sm:$0xff]   ;;  %v1966_v32 = vld [vmem:[%s2293_s0 + $0x70] sm:$0xff]  }
   0xb   :  { %1862 = vmatpush3.bf16.msra.mxu0 %v490_v5  ;;  %1932 = vmatpush3.bf16.msra.mxu1 %v490_v5  ;;  %v1963_v29 = vld [vmem:[%s2293_s0 + $0xe0] sm:$0xff]   ;;  %v1965_v31 = vld [vmem:[%s2293_s0 + $0xe8] sm:$0xff]   ;;  %v1967_v33 = vld [vmem:[%s2293_s0 + $0xf0] sm:$0xff]  }
   0xc   :  { %v1968_v34 = vld [vmem:[%s2293_s0 + $0x78] sm:$0xff]   ;;  %v2130_v36 = vld [vmem:[%s2294_s2] ss:$0 sm:$0xff] }
   0xd   :  { %v1969_v35 = vld [vmem:[%s2293_s0 + $0xf8] sm:$0xff]  }
   0xe   :  { %1864 = vmatmul.mubr.msk.bf16.vlgmr.msra.gmra.mrb[0].mxu0 %vm391_vm0, %v1940_v6  ;;  %1896 = vmatmul.mubr.msk.bf16.vlgmr.msra.gmra.mrb[0].mxu1 %vm391_vm0, %v1941_v7 }
   0xf   :  { %1867 = vmatprep.mubr.msk.bf16.mxu0 %vm391_vm0, %v1942_v8  ;;  %1899 = vmatprep.mubr.msk.bf16.mxu1 %vm391_vm0, %v1943_v9 }
  0x16   :  { %1868 = vmatmul.mubr.msk.bf16.gmra.mrb[4].mxu0 %vm391_vm0, %v1944_v10  ;;  %1900 = vmatmul.mubr.msk.bf16.gmra.mrb[4].mxu1 %vm391_vm0, %v1945_v11 }
  0x17   :  { %1871 = vmatprep.mubr.msk.bf16.mxu0 %vm391_vm0, %v1946_v12  ;;  %1903 = vmatprep.mubr.msk.bf16.mxu1 %vm391_vm0, %v1947_v13 }
  0x1e   :  { %1872 = vmatmul.mubr.msk.bf16.gmra.mrb[8].mxu0 %vm391_vm0, %v1948_v14  ;;  %1904 = vmatmul.mubr.msk.bf16.gmra.mrb[8].mxu1 %vm391_vm0, %v1949_v15 }
  0x1f   :  { %1875 = vmatprep.mubr.msk.bf16.mxu0 %vm391_vm0, %v1950_v16  ;;  %1907 = vmatprep.mubr.msk.bf16.mxu1 %vm391_vm0, %v1951_v17 }
  0x26   :  { %1876 = vmatmul.mubr.msk.bf16.gmra.mrb[12].mxu0 %vm391_vm0, %v1952_v18  ;;  %1908 = vmatmul.mubr.msk.bf16.gmra.mrb[12].mxu1 %vm391_vm0, %v1953_v19 }
  0x27   :  { %1879 = vmatprep.mubr.msk.bf16.mxu0 %vm391_vm0, %v1954_v20  ;;  %1911 = vmatprep.mubr.msk.bf16.mxu1 %vm391_vm0, %v1955_v21 }
  0x2e   :  { %1880 = vmatmul.mubr.msk.bf16.gmra.mrb[16].mxu0 %vm391_vm0, %v1956_v22  ;;  %1912 = vmatmul.mubr.msk.bf16.gmra.mrb[16].mxu1 %vm391_vm0, %v1957_v23 }
  0x2f   :  { %1883 = vmatprep.mubr.msk.bf16.mxu0 %vm391_vm0, %v1958_v24  ;;  %1915 = vmatprep.mubr.msk.bf16.mxu1 %vm391_vm0, %v1959_v25 }
  0x36   :  { %1884 = vmatmul.mubr.msk.bf16.gmra.mrb[20].mxu0 %vm391_vm0, %v1960_v26  ;;  %1916 = vmatmul.mubr.msk.bf16.gmra.mrb[20].mxu1 %vm391_vm0, %v1961_v27 }
  0x37   :  { %1887 = vmatprep.mubr.msk.bf16.mxu0 %vm391_vm0, %v1962_v28  ;;  %1919 = vmatprep.mubr.msk.bf16.mxu1 %vm391_vm0, %v1963_v29 }
  0x3e   :  { %1888 = vmatmul.mubr.msk.bf16.gmra.mrb[24].mxu0 %vm391_vm0, %v1964_v30  ;;  %1920 = vmatmul.mubr.msk.bf16.gmra.mrb[24].mxu1 %vm391_vm0, %v1965_v31 }
  0x3f   :  { %1891 = vmatprep.mubr.msk.bf16.mxu0 %vm391_vm0, %v1966_v32  ;;  %1923 = vmatprep.mubr.msk.bf16.mxu1 %vm391_vm0, %v1967_v33 }
  0x46   :  { %1892 = vmatmul.mubr.msk.bf16.gmra.mrb[28].mxu0 %vm391_vm0, %v1968_v34  ;;  %1924 = vmatmul.mubr.msk.bf16.gmra.mrb[28].mxu1 %vm391_vm0, %v1969_v35 }
  0xe1   :  { %v1865_v37 = vpop.f32.mrb[0].mxu0  ;;  %v1897_v38 = vpop.f32.mrb[0].mxu1 }
  0xe2   :  { %v985_v39 = vadd.f32 %v1865_v37, %v2130_v36  ;;  %v1017_v40 = vadd.f32 %v1897_v38, %v2130_v36  ;;  %v526_v41 = vpop.f32.mrb[1].mxu0  ;;  %v654_v42 = vpop.f32.mrb[1].mxu1 }
  0xe3   :  { %v983_v43 = vadd.f32 %v2130_v36, %v526_v41  ;;  %v1015_v44 = vadd.f32 %v2130_v36, %v654_v42  ;;  %v1866_v45 = vpop.f32.mrb[2].mxu0  ;;  %v1898_v46 = vpop.f32.mrb[2].mxu1 }
  0xe4   :  { %v986_v47 = vadd.f32 %v1866_v45, %v2130_v36  ;;  %v1018_v48 = vadd.f32 %v1898_v46, %v2130_v36  ;;  %v529_v49 = vpop.f32.mrb[3].mxu0  ;;  %v657_v50 = vpop.f32.mrb[3].mxu1  ;;  %v1049_v53 = vmax.f32 %v985_v39, 0.0  ;;  %v1081_v54 = vmax.f32 %v1017_v40, 0.0 }
  0xe5   :  { %v984_v51 = vadd.f32 %v2130_v36, %v529_v49  ;;  %v1016_v52 = vadd.f32 %v2130_v36, %v657_v50  ;;  %v1047_v57 = vmax.f32 %v983_v43, 0.0  ;;  %v1079_v58 = vmax.f32 %v1015_v44, 0.0 }
  0xe6   :  { %v1050_v55 = vmax.f32 %v986_v47, 0.0  ;;  %v1082_v56 = vmax.f32 %v1018_v48, 0.0 }
  0xe7   :  { %v1048_v59 = vmax.f32 %v984_v51, 0.0  ;;  %v1080_v60 = vmax.f32 %v1016_v52, 0.0 }
  0xe8   :  { %v1639_v61 = vpack.c.bf16 %v1050_v55, %v1049_v53  ;;  %v1719_v62 = vpack.c.bf16 %v1082_v56, %v1081_v54 }
  0xe9   :  { %v1634_v63 = vpack.c.bf16 %v1048_v59, %v1047_v57  ;;  %v1714_v0 = vpack.c.bf16 %v1080_v60, %v1079_v58  ;;  %v1869_v1 = vpop.f32.mrb[4].mxu0  ;;  %v1901_v2 = vpop.f32.mrb[4].mxu1 }
  0xea   :  { %1791 = vst [vmem:[%s2295_s3 + $0x8] sm:$0xff] %v1639_v61   ;;  %1807 = vst [vmem:[%s2295_s3 + $0x88] sm:$0xff] %v1719_v62   ;;  %v989_v3 = vadd.f32 %v1869_v1, %v2130_v36  ;;  %v1021_v4 = vadd.f32 %v1901_v2, %v2130_v36  ;;  %v542_v5 = vpop.f32.mrb[5].mxu0  ;;  %v670_v6 = vpop.f32.mrb[5].mxu1 }
  0xeb   :  { %1635 = vst [vmem:[%s2295_s3] sm:$0xff] %v1634_v63   ;;  %1806 = vst [vmem:[%s2295_s3 + $0x80] sm:$0xff] %v1714_v0   ;;  %v987_v7 = vadd.f32 %v2130_v36, %v542_v5  ;;  %v1019_v8 = vadd.f32 %v2130_v36, %v670_v6  ;;  %v1870_v9 = vpop.f32.mrb[6].mxu0  ;;  %v1902_v10 = vpop.f32.mrb[6].mxu1 }
  0xec   :  { %v990_v11 = vadd.f32 %v1870_v9, %v2130_v36  ;;  %v1022_v12 = vadd.f32 %v1902_v10, %v2130_v36  ;;  %v545_v13 = vpop.f32.mrb[7].mxu0  ;;  %v673_v14 = vpop.f32.mrb[7].mxu1  ;;  %v1053_v17 = vmax.f32 %v989_v3, 0.0  ;;  %v1085_v18 = vmax.f32 %v1021_v4, 0.0 }
  0xed   :  { %v988_v15 = vadd.f32 %v2130_v36, %v545_v13  ;;  %v1020_v16 = vadd.f32 %v2130_v36, %v673_v14  ;;  %v1051_v21 = vmax.f32 %v987_v7, 0.0  ;;  %v1083_v22 = vmax.f32 %v1019_v8, 0.0 }
  0xee   :  { %v1054_v19 = vmax.f32 %v990_v11, 0.0  ;;  %v1086_v20 = vmax.f32 %v1022_v12, 0.0 }
  0xef   :  { %v1052_v23 = vmax.f32 %v988_v15, 0.0  ;;  %v1084_v24 = vmax.f32 %v1020_v16, 0.0 }
  0xf0   :  { %v1649_v25 = vpack.c.bf16 %v1054_v19, %v1053_v17  ;;  %v1729_v26 = vpack.c.bf16 %v1086_v20, %v1085_v18 }
  0xf1   :  { %v1644_v27 = vpack.c.bf16 %v1052_v23, %v1051_v21  ;;  %v1724_v28 = vpack.c.bf16 %v1084_v24, %v1083_v22  ;;  %v1873_v29 = vpop.f32.mrb[8].mxu0  ;;  %v1905_v30 = vpop.f32.mrb[8].mxu1 }
  0xf2   :  { %1793 = vst [vmem:[%s2295_s3 + $0x18] sm:$0xff] %v1649_v25   ;;  %1809 = vst [vmem:[%s2295_s3 + $0x98] sm:$0xff] %v1729_v26   ;;  %v993_v31 = vadd.f32 %v1873_v29, %v2130_v36  ;;  %v1025_v32 = vadd.f32 %v1905_v30, %v2130_v36  ;;  %v558_v33 = vpop.f32.mrb[9].mxu0  ;;  %v686_v34 = vpop.f32.mrb[9].mxu1 }
  0xf3   :  { %1792 = vst [vmem:[%s2295_s3 + $0x10] sm:$0xff] %v1644_v27   ;;  %1808 = vst [vmem:[%s2295_s3 + $0x90] sm:$0xff] %v1724_v28   ;;  %v991_v35 = vadd.f32 %v2130_v36, %v558_v33  ;;  %v1023_v37 = vadd.f32 %v2130_v36, %v686_v34  ;;  %v1874_v38 = vpop.f32.mrb[10].mxu0  ;;  %v1906_v39 = vpop.f32.mrb[10].mxu1 }
  0xf4   :  { %v994_v40 = vadd.f32 %v1874_v38, %v2130_v36  ;;  %v1026_v41 = vadd.f32 %v1906_v39, %v2130_v36  ;;  %v561_v42 = vpop.f32.mrb[11].mxu0  ;;  %v689_v43 = vpop.f32.mrb[11].mxu1  ;;  %v1057_v46 = vmax.f32 %v993_v31, 0.0  ;;  %v1089_v47 = vmax.f32 %v1025_v32, 0.0 }
  0xf5   :  { %v992_v44 = vadd.f32 %v2130_v36, %v561_v42  ;;  %v1024_v45 = vadd.f32 %v2130_v36, %v689_v43  ;;  %v1055_v50 = vmax.f32 %v991_v35, 0.0  ;;  %v1087_v51 = vmax.f32 %v1023_v37, 0.0 }
  0xf6   :  { %v1058_v48 = vmax.f32 %v994_v40, 0.0  ;;  %v1090_v49 = vmax.f32 %v1026_v41, 0.0 }
  0xf7   :  { %v1056_v52 = vmax.f32 %v992_v44, 0.0  ;;  %v1088_v53 = vmax.f32 %v1024_v45, 0.0 }
  0xf8   :  { %v1659_v54 = vpack.c.bf16 %v1058_v48, %v1057_v46  ;;  %v1739_v55 = vpack.c.bf16 %v1090_v49, %v1089_v47 }
  0xf9   :  { %v1654_v56 = vpack.c.bf16 %v1056_v52, %v1055_v50  ;;  %v1734_v57 = vpack.c.bf16 %v1088_v53, %v1087_v51  ;;  %v1877_v58 = vpop.f32.mrb[12].mxu0  ;;  %v1909_v59 = vpop.f32.mrb[12].mxu1 }
  0xfa   :  { %1795 = vst [vmem:[%s2295_s3 + $0x28] sm:$0xff] %v1659_v54   ;;  %1811 = vst [vmem:[%s2295_s3 + $0xa8] sm:$0xff] %v1739_v55   ;;  %v997_v60 = vadd.f32 %v1877_v58, %v2130_v36  ;;  %v1029_v61 = vadd.f32 %v1909_v59, %v2130_v36  ;;  %v574_v62 = vpop.f32.mrb[13].mxu0  ;;  %v702_v63 = vpop.f32.mrb[13].mxu1 }
  0xfb   :  { %1794 = vst [vmem:[%s2295_s3 + $0x20] sm:$0xff] %v1654_v56   ;;  %1810 = vst [vmem:[%s2295_s3 + $0xa0] sm:$0xff] %v1734_v57   ;;  %v995_v0 = vadd.f32 %v2130_v36, %v574_v62  ;;  %v1027_v1 = vadd.f32 %v2130_v36, %v702_v63  ;;  %v1878_v2 = vpop.f32.mrb[14].mxu0  ;;  %v1910_v3 = vpop.f32.mrb[14].mxu1 }
  0xfc   :  { %v998_v4 = vadd.f32 %v1878_v2, %v2130_v36  ;;  %v1030_v5 = vadd.f32 %v1910_v3, %v2130_v36  ;;  %v577_v6 = vpop.f32.mrb[15].mxu0  ;;  %v705_v7 = vpop.f32.mrb[15].mxu1  ;;  %v1061_v10 = vmax.f32 %v997_v60, 0.0  ;;  %v1093_v11 = vmax.f32 %v1029_v61, 0.0 }
  0xfd   :  { %v996_v8 = vadd.f32 %v2130_v36, %v577_v6  ;;  %v1028_v9 = vadd.f32 %v2130_v36, %v705_v7  ;;  %v1059_v14 = vmax.f32 %v995_v0, 0.0  ;;  %v1091_v15 = vmax.f32 %v1027_v1, 0.0 }
  0xfe   :  { %v1062_v12 = vmax.f32 %v998_v4, 0.0  ;;  %v1094_v13 = vmax.f32 %v1030_v5, 0.0 }
  0xff   :  { %v1060_v16 = vmax.f32 %v996_v8, 0.0  ;;  %v1092_v17 = vmax.f32 %v1028_v9, 0.0 }
 0x100   :  { %v1669_v18 = vpack.c.bf16 %v1062_v12, %v1061_v10  ;;  %v1749_v19 = vpack.c.bf16 %v1094_v13, %v1093_v11 }
 0x101   :  { %v1664_v20 = vpack.c.bf16 %v1060_v16, %v1059_v14  ;;  %v1744_v21 = vpack.c.bf16 %v1092_v17, %v1091_v15  ;;  %v1881_v22 = vpop.f32.mrb[16].mxu0  ;;  %v1913_v23 = vpop.f32.mrb[16].mxu1 }
 0x102   :  { %1797 = vst [vmem:[%s2295_s3 + $0x38] sm:$0xff] %v1669_v18   ;;  %1813 = vst [vmem:[%s2295_s3 + $0xb8] sm:$0xff] %v1749_v19   ;;  %v1001_v24 = vadd.f32 %v1881_v22, %v2130_v36  ;;  %v1033_v25 = vadd.f32 %v1913_v23, %v2130_v36  ;;  %v590_v26 = vpop.f32.mrb[17].mxu0  ;;  %v718_v27 = vpop.f32.mrb[17].mxu1 }
 0x103   :  { %1796 = vst [vmem:[%s2295_s3 + $0x30] sm:$0xff] %v1664_v20   ;;  %1812 = vst [vmem:[%s2295_s3 + $0xb0] sm:$0xff] %v1744_v21   ;;  %v999_v28 = vadd.f32 %v2130_v36, %v590_v26  ;;  %v1031_v29 = vadd.f32 %v2130_v36, %v718_v27  ;;  %v1882_v30 = vpop.f32.mrb[18].mxu0  ;;  %v1914_v31 = vpop.f32.mrb[18].mxu1 }
 0x104   :  { %v1002_v32 = vadd.f32 %v1882_v30, %v2130_v36  ;;  %v1034_v33 = vadd.f32 %v1914_v31, %v2130_v36  ;;  %v593_v34 = vpop.f32.mrb[19].mxu0  ;;  %v721_v35 = vpop.f32.mrb[19].mxu1  ;;  %v1065_v39 = vmax.f32 %v1001_v24, 0.0  ;;  %v1097_v40 = vmax.f32 %v1033_v25, 0.0 }
 0x105   :  { %v1000_v37 = vadd.f32 %v2130_v36, %v593_v34  ;;  %v1032_v38 = vadd.f32 %v2130_v36, %v721_v35  ;;  %v1063_v43 = vmax.f32 %v999_v28, 0.0  ;;  %v1095_v44 = vmax.f32 %v1031_v29, 0.0 }
 0x106   :  { %v1066_v41 = vmax.f32 %v1002_v32, 0.0  ;;  %v1098_v42 = vmax.f32 %v1034_v33, 0.0 }
 0x107   :  { %v1064_v45 = vmax.f32 %v1000_v37, 0.0  ;;  %v1096_v46 = vmax.f32 %v1032_v38, 0.0 }
 0x108   :  { %v1679_v47 = vpack.c.bf16 %v1066_v41, %v1065_v39  ;;  %v1759_v48 = vpack.c.bf16 %v1098_v42, %v1097_v40 }
 0x109   :  { %v1674_v49 = vpack.c.bf16 %v1064_v45, %v1063_v43  ;;  %v1754_v50 = vpack.c.bf16 %v1096_v46, %v1095_v44  ;;  %v1885_v51 = vpop.f32.mrb[20].mxu0  ;;  %v1917_v52 = vpop.f32.mrb[20].mxu1 }
 0x10a   :  { %1799 = vst [vmem:[%s2295_s3 + $0x48] sm:$0xff] %v1679_v47   ;;  %1815 = vst [vmem:[%s2295_s3 + $0xc8] sm:$0xff] %v1759_v48   ;;  %v1005_v53 = vadd.f32 %v1885_v51, %v2130_v36  ;;  %v1037_v54 = vadd.f32 %v1917_v52, %v2130_v36  ;;  %v606_v55 = vpop.f32.mrb[21].mxu0  ;;  %v734_v56 = vpop.f32.mrb[21].mxu1 }
 0x10b   :  { %1798 = vst [vmem:[%s2295_s3 + $0x40] sm:$0xff] %v1674_v49   ;;  %1814 = vst [vmem:[%s2295_s3 + $0xc0] sm:$0xff] %v1754_v50   ;;  %v1003_v57 = vadd.f32 %v2130_v36, %v606_v55  ;;  %v1035_v58 = vadd.f32 %v2130_v36, %v734_v56  ;;  %v1886_v59 = vpop.f32.mrb[22].mxu0  ;;  %v1918_v60 = vpop.f32.mrb[22].mxu1 }
 0x10c   :  { %v1006_v61 = vadd.f32 %v1886_v59, %v2130_v36  ;;  %v1038_v62 = vadd.f32 %v1918_v60, %v2130_v36  ;;  %v609_v63 = vpop.f32.mrb[23].mxu0  ;;  %v737_v0 = vpop.f32.mrb[23].mxu1  ;;  %v1069_v3 = vmax.f32 %v1005_v53, 0.0  ;;  %v1101_v4 = vmax.f32 %v1037_v54, 0.0 }
 0x10d   :  { %v1004_v1 = vadd.f32 %v2130_v36, %v609_v63  ;;  %v1036_v2 = vadd.f32 %v2130_v36, %v737_v0  ;;  %v1067_v7 = vmax.f32 %v1003_v57, 0.0  ;;  %v1099_v8 = vmax.f32 %v1035_v58, 0.0 }
 0x10e   :  { %v1070_v5 = vmax.f32 %v1006_v61, 0.0  ;;  %v1102_v6 = vmax.f32 %v1038_v62, 0.0 }
 0x10f   :  { %v1068_v9 = vmax.f32 %v1004_v1, 0.0  ;;  %v1100_v10 = vmax.f32 %v1036_v2, 0.0 }
 0x110   :  { %v1689_v11 = vpack.c.bf16 %v1070_v5, %v1069_v3  ;;  %v1769_v12 = vpack.c.bf16 %v1102_v6, %v1101_v4 }
 0x111   :  { %v1684_v13 = vpack.c.bf16 %v1068_v9, %v1067_v7  ;;  %v1764_v14 = vpack.c.bf16 %v1100_v10, %v1099_v8  ;;  %v1889_v15 = vpop.f32.mrb[24].mxu0  ;;  %v1921_v16 = vpop.f32.mrb[24].mxu1 }
 0x112   :  { %1801 = vst [vmem:[%s2295_s3 + $0x58] sm:$0xff] %v1689_v11   ;;  %1817 = vst [vmem:[%s2295_s3 + $0xd8] sm:$0xff] %v1769_v12   ;;  %v1009_v17 = vadd.f32 %v1889_v15, %v2130_v36  ;;  %v1041_v18 = vadd.f32 %v1921_v16, %v2130_v36  ;;  %v622_v19 = vpop.f32.mrb[25].mxu0  ;;  %v750_v20 = vpop.f32.mrb[25].mxu1 }
 0x113   :  { %1800 = vst [vmem:[%s2295_s3 + $0x50] sm:$0xff] %v1684_v13   ;;  %1816 = vst [vmem:[%s2295_s3 + $0xd0] sm:$0xff] %v1764_v14   ;;  %v1007_v21 = vadd.f32 %v2130_v36, %v622_v19  ;;  %v1039_v22 = vadd.f32 %v2130_v36, %v750_v20  ;;  %v1890_v23 = vpop.f32.mrb[26].mxu0  ;;  %v1922_v24 = vpop.f32.mrb[26].mxu1 }
 0x114   :  { %v1010_v25 = vadd.f32 %v1890_v23, %v2130_v36  ;;  %v1042_v26 = vadd.f32 %v1922_v24, %v2130_v36  ;;  %v625_v27 = vpop.f32.mrb[27].mxu0  ;;  %v753_v28 = vpop.f32.mrb[27].mxu1  ;;  %v1073_v31 = vmax.f32 %v1009_v17, 0.0  ;;  %v1105_v32 = vmax.f32 %v1041_v18, 0.0 }
 0x115   :  { %v1008_v29 = vadd.f32 %v2130_v36, %v625_v27  ;;  %v1040_v30 = vadd.f32 %v2130_v36, %v753_v28  ;;  %v1071_v35 = vmax.f32 %v1007_v21, 0.0  ;;  %v1103_v37 = vmax.f32 %v1039_v22, 0.0 }
 0x116   :  { %v1074_v33 = vmax.f32 %v1010_v25, 0.0  ;;  %v1106_v34 = vmax.f32 %v1042_v26, 0.0 }
 0x117   :  { %v1072_v38 = vmax.f32 %v1008_v29, 0.0  ;;  %v1104_v39 = vmax.f32 %v1040_v30, 0.0 }
 0x118   :  { %v1699_v40 = vpack.c.bf16 %v1074_v33, %v1073_v31  ;;  %v1779_v41 = vpack.c.bf16 %v1106_v34, %v1105_v32 }
 0x119   :  { %v1694_v42 = vpack.c.bf16 %v1072_v38, %v1071_v35  ;;  %v1774_v43 = vpack.c.bf16 %v1104_v39, %v1103_v37  ;;  %v1893_v44 = vpop.f32.mrb[28].mxu0  ;;  %v1925_v45 = vpop.f32.mrb[28].mxu1 }
 0x11a   :  { %1803 = vst [vmem:[%s2295_s3 + $0x68] sm:$0xff] %v1699_v40   ;;  %1819 = vst [vmem:[%s2295_s3 + $0xe8] sm:$0xff] %v1779_v41   ;;  %v1013_v46 = vadd.f32 %v1893_v44, %v2130_v36  ;;  %v1045_v47 = vadd.f32 %v1925_v45, %v2130_v36  ;;  %v638_v48 = vpop.f32.mrb[29].mxu0  ;;  %v766_v49 = vpop.f32.mrb[29].mxu1 }
 0x11b   :  { %1802 = vst [vmem:[%s2295_s3 + $0x60] sm:$0xff] %v1694_v42   ;;  %1818 = vst [vmem:[%s2295_s3 + $0xe0] sm:$0xff] %v1774_v43   ;;  %v1011_v50 = vadd.f32 %v2130_v36, %v638_v48  ;;  %v1043_v51 = vadd.f32 %v2130_v36, %v766_v49  ;;  %v1894_v52 = vpop.f32.mrb[30].mxu0  ;;  %v1926_v53 = vpop.f32.mrb[30].mxu1 }
 0x11c   :  { %v1014_v54 = vadd.f32 %v1894_v52, %v2130_v36  ;;  %v1046_v55 = vadd.f32 %v1926_v53, %v2130_v36  ;;  %v641_v56 = vpop.f32.mrb[31].mxu0  ;;  %v769_v57 = vpop.f32.mrb[31].mxu1  ;;  %v1077_v60 = vmax.f32 %v1013_v46, 0.0  ;;  %v1109_v61 = vmax.f32 %v1045_v47, 0.0 }
 0x11d   :  { %v1012_v58 = vadd.f32 %v2130_v36, %v641_v56  ;;  %v1044_v59 = vadd.f32 %v2130_v36, %v769_v57  ;;  %v1075_v0 = vmax.f32 %v1011_v50, 0.0  ;;  %v1107_v1 = vmax.f32 %v1043_v51, 0.0 }
 0x11e   :  { %v1078_v62 = vmax.f32 %v1014_v54, 0.0  ;;  %v1110_v63 = vmax.f32 %v1046_v55, 0.0 }
 0x11f   :  { %v1076_v2 = vmax.f32 %v1012_v58, 0.0  ;;  %v1108_v3 = vmax.f32 %v1044_v59, 0.0 }
 0x120   :  { %v1709_v4 = vpack.c.bf16 %v1078_v62, %v1077_v60  ;;  %v1789_v5 = vpack.c.bf16 %v1110_v63, %v1109_v61 }
 0x121   :  { %v1704_v6 = vpack.c.bf16 %v1076_v2, %v1075_v0  ;;  %v1784_v7 = vpack.c.bf16 %v1108_v3, %v1107_v1 }
 0x122   :  { %1805 = vst [vmem:[%s2295_s3 + $0x78] sm:$0xff] %v1709_v4   ;;  %1821 = vst [vmem:[%s2295_s3 + $0xf8] sm:$0xff] %v1789_v5  }
 0x123   :  { %1804 = vst [vmem:[%s2295_s3 + $0x70] sm:$0xff] %v1704_v6   ;;  %1820 = vst [vmem:[%s2295_s3 + $0xf0] sm:$0xff] %v1784_v7  }

// kernel: basic_block_forward.3
= control target key start
LH: loop header
LB: loop body
LE: loop exit
PB: predicated region body
PF: predicated region fallthrough
CT: control target
= control target key end

     0   :  { %vm394_vm0 = vcmask 293888   ;;  %vm491_vm1 = vcmask 1041408   ;;  %s2268_s1 = inlined_call_operand.vmem [shape: bf16[36,128], index: 1, kind: input, shape index: {}]   ;;  %s2269_s0 = inlined_call_operand.vmem [shape: bf16[512,36], index: 0, kind: input, shape index: {}]   ;;  %s2270_s3 = inlined_call_operand.vmem [shape: bf16[512,128], index: 3, kind: input, shape index: {}]   ;;  %s2271_s2 = inlined_call_operand.vmem [shape: f32[1,128], index: 2, kind: input, shape index: {}]   ;;  %s2272_s4 = inlined_call_operand.vmem [shape: f32[512,128], index: 4, kind: output, shape index: {}]  }
   0x1   :  { %v1714_v0 = vld [vmem:[%s2268_s1] sm:$0xff]   ;;  %v1715_v1 = vld [vmem:[%s2268_s1 + $0x8] sm:$0xff]   ;;  %v1716_v2 = vld [vmem:[%s2268_s1 + $0x10] ss:$0 sps:$4 sm:$0x33]  }
   0x2   :  { %1636 = vmatprep.subr.bf16.mxu0 %v1714_v0  ;;  %1706 = vmatprep.subr.bf16.mxu1 %v1714_v0  ;;  %v1717_v3 = vld [vmem:[%s2269_s0] sm:$0xff]   ;;  %v493_v5 = vsel %vm491_vm1, %v1716_v2, 0  ;;  %v1719_v6 = vld [vmem:[%s2269_s0 + $0x8] sm:$0xff]   ;;  %v1721_v8 = vld [vmem:[%s2269_s0 + $0x10] sm:$0xff]  }
   0x3   :  { %1637 = vmatpush3.bf16.msra.mxu0 %v1714_v0  ;;  %1709 = vmatpush3.bf16.msra.mxu1 %v1714_v0  ;;  %v1718_v4 = vld [vmem:[%s2269_s0 + $0x80] sm:$0xff]   ;;  %v1720_v7 = vld [vmem:[%s2269_s0 + $0x88] sm:$0xff]   ;;  %v1722_v9 = vld [vmem:[%s2269_s0 + $0x90] sm:$0xff]  }
   0x4   :  { %1638 = vmatprep.subr.bf16.mxu0 %v1715_v1  ;;  %1707 = vmatprep.subr.bf16.mxu1 %v1715_v1  ;;  %v1723_v10 = vld [vmem:[%s2269_s0 + $0x18] sm:$0xff]   ;;  %v1725_v12 = vld [vmem:[%s2269_s0 + $0x20] sm:$0xff]   ;;  %v1727_v14 = vld [vmem:[%s2269_s0 + $0x28] sm:$0xff]  }
   0x5   :  { %1642 = vmatprep.mubr.msk.bf16.mxu0 %vm394_vm0, %v1717_v3  ;;  %1674 = vmatprep.mubr.msk.bf16.mxu1 %vm394_vm0, %v1718_v4  ;;  %v1724_v11 = vld [vmem:[%s2269_s0 + $0x98] sm:$0xff]   ;;  %v1726_v13 = vld [vmem:[%s2269_s0 + $0xa0] sm:$0xff]   ;;  %v1728_v15 = vld [vmem:[%s2269_s0 + $0xa8] sm:$0xff]  }
   0x6   :  { %v1729_v16 = vld [vmem:[%s2269_s0 + $0x30] sm:$0xff]   ;;  %v1731_v18 = vld [vmem:[%s2269_s0 + $0x38] sm:$0xff]   ;;  %v1733_v20 = vld [vmem:[%s2269_s0 + $0x40] sm:$0xff]  }
   0x7   :  { %1639 = vmatpush3.bf16.msra.mxu0 %v1715_v1  ;;  %1710 = vmatpush3.bf16.msra.mxu1 %v1715_v1  ;;  %v1730_v17 = vld [vmem:[%s2269_s0 + $0xb0] sm:$0xff]   ;;  %v1732_v19 = vld [vmem:[%s2269_s0 + $0xb8] sm:$0xff]   ;;  %v1734_v21 = vld [vmem:[%s2269_s0 + $0xc0] sm:$0xff]  }
   0x8   :  { %1712 = vmatprep.subr.msk.bf16.mxu0 %vm491_vm1, %v1716_v2  ;;  %1713 = vmatprep.subr.msk.bf16.mxu1 %vm491_vm1, %v1716_v2  ;;  %v1735_v22 = vld [vmem:[%s2269_s0 + $0x48] sm:$0xff]   ;;  %v1737_v24 = vld [vmem:[%s2269_s0 + $0x50] sm:$0xff]   ;;  %v1739_v26 = vld [vmem:[%s2269_s0 + $0x58] sm:$0xff]  }
   0x9   :  { %v1736_v23 = vld [vmem:[%s2269_s0 + $0xc8] sm:$0xff]   ;;  %v1738_v25 = vld [vmem:[%s2269_s0 + $0xd0] sm:$0xff]   ;;  %v1740_v27 = vld [vmem:[%s2269_s0 + $0xd8] sm:$0xff]  }
   0xa   :  { %v1741_v28 = vld [vmem:[%s2269_s0 + $0x60] sm:$0xff]   ;;  %v1743_v30 = vld [vmem:[%s2269_s0 + $0x68] sm:$0xff]   ;;  %v1745_v32 = vld [vmem:[%s2269_s0 + $0x70] sm:$0xff]  }
   0xb   :  { %1641 = vmatpush3.bf16.msra.mxu0 %v493_v5  ;;  %1711 = vmatpush3.bf16.msra.mxu1 %v493_v5  ;;  %v1742_v29 = vld [vmem:[%s2269_s0 + $0xe0] sm:$0xff]   ;;  %v1744_v31 = vld [vmem:[%s2269_s0 + $0xe8] sm:$0xff]   ;;  %v1746_v33 = vld [vmem:[%s2269_s0 + $0xf0] sm:$0xff]  }
   0xc   :  { %v1747_v34 = vld [vmem:[%s2269_s0 + $0x78] sm:$0xff]   ;;  %v1570_v36 = vld [vmem:[%s2270_s3 + $0x8] sm:$0xff]   ;;  %v1443_v38 = vld [vmem:[%s2270_s3] sm:$0xff]  }
   0xd   :  { %v1748_v35 = vld [vmem:[%s2269_s0 + $0xf8] sm:$0xff]   ;;  %v1586_v37 = vld [vmem:[%s2270_s3 + $0x88] sm:$0xff]   ;;  %v1585_v39 = vld [vmem:[%s2270_s3 + $0x80] sm:$0xff]   ;;  %v1448_v41 = vunpack.c.l.bf16 %v1570_v36  ;;  %v1444_v45 = vunpack.c.l.bf16 %v1443_v38  ;;  %v1449_v51 = vunpack.c.h.bf16 %v1570_v36  ;;  %v1445_v57 = vunpack.c.h.bf16 %v1443_v38 }
   0xe   :  { %1643 = vmatmul.mubr.msk.bf16.vlgmr.msra.gmra.mrb[0].mxu0 %vm394_vm0, %v1719_v6  ;;  %1675 = vmatmul.mubr.msk.bf16.vlgmr.msra.gmra.mrb[0].mxu1 %vm394_vm0, %v1720_v7  ;;  %v1926_v40 = vld [vmem:[%s2271_s2] ss:$0 sm:$0xff]  ;;  %v1512_v42 = vunpack.c.l.bf16 %v1586_v37  ;;  %v1508_v46 = vunpack.c.l.bf16 %v1585_v39  ;;  %v1513_v52 = vunpack.c.h.bf16 %v1586_v37  ;;  %v1509_v58 = vunpack.c.h.bf16 %v1585_v39  ;;  %v1572_v5 = vld [vmem:[%s2270_s3 + $0x18] sm:$0xff]  }
   0xf   :  { %1646 = vmatprep.mubr.msk.bf16.mxu0 %vm394_vm0, %v1721_v8  ;;  %1678 = vmatprep.mubr.msk.bf16.mxu1 %vm394_vm0, %v1722_v9  ;;  %v1588_v6 = vld [vmem:[%s2270_s3 + $0x98] sm:$0xff]  }
  0x16   :  { %1647 = vmatmul.mubr.msk.bf16.gmra.mrb[4].mxu0 %vm394_vm0, %v1723_v10  ;;  %1679 = vmatmul.mubr.msk.bf16.gmra.mrb[4].mxu1 %vm394_vm0, %v1724_v11  ;;  %v1571_v11 = vld [vmem:[%s2270_s3 + $0x10] sm:$0xff]  }
  0x17   :  { %1650 = vmatprep.mubr.msk.bf16.mxu0 %vm394_vm0, %v1725_v12  ;;  %1682 = vmatprep.mubr.msk.bf16.mxu1 %vm394_vm0, %v1726_v13  ;;  %v1587_v12 = vld [vmem:[%s2270_s3 + $0x90] sm:$0xff]   ;;  %v1453_v37 = vunpack.c.h.bf16 %v1571_v11 }
  0x18   :  { %v1517_v38 = vunpack.c.h.bf16 %v1587_v12 }
  0x1e   :  { %1651 = vmatmul.mubr.msk.bf16.gmra.mrb[8].mxu0 %vm394_vm0, %v1727_v14  ;;  %1683 = vmatmul.mubr.msk.bf16.gmra.mrb[8].mxu1 %vm394_vm0, %v1728_v15 }
  0x1f   :  { %1654 = vmatprep.mubr.msk.bf16.mxu0 %vm394_vm0, %v1729_v16  ;;  %1686 = vmatprep.mubr.msk.bf16.mxu1 %vm394_vm0, %v1730_v17 }
  0x26   :  { %1655 = vmatmul.mubr.msk.bf16.gmra.mrb[12].mxu0 %vm394_vm0, %v1731_v18  ;;  %1687 = vmatmul.mubr.msk.bf16.gmra.mrb[12].mxu1 %vm394_vm0, %v1732_v19  ;;  %v1456_v19 = vunpack.c.l.bf16 %v1572_v5 }
  0x27   :  { %1658 = vmatprep.mubr.msk.bf16.mxu0 %vm394_vm0, %v1733_v20  ;;  %1690 = vmatprep.mubr.msk.bf16.mxu1 %vm394_vm0, %v1734_v21  ;;  %v1520_v20 = vunpack.c.l.bf16 %v1588_v6 }
  0x2e   :  { %1659 = vmatmul.mubr.msk.bf16.gmra.mrb[16].mxu0 %vm394_vm0, %v1735_v22  ;;  %1691 = vmatmul.mubr.msk.bf16.gmra.mrb[16].mxu1 %vm394_vm0, %v1736_v23 }
  0x2f   :  { %1662 = vmatprep.mubr.msk.bf16.mxu0 %vm394_vm0, %v1737_v24  ;;  %1694 = vmatprep.mubr.msk.bf16.mxu1 %vm394_vm0, %v1738_v25  ;;  %v1452_v25 = vunpack.c.l.bf16 %v1571_v11 }
  0x36   :  { %1663 = vmatmul.mubr.msk.bf16.gmra.mrb[20].mxu0 %vm394_vm0, %v1739_v26  ;;  %1695 = vmatmul.mubr.msk.bf16.gmra.mrb[20].mxu1 %vm394_vm0, %v1740_v27  ;;  %v1516_v26 = vunpack.c.l.bf16 %v1587_v12 }
  0x37   :  { %1666 = vmatprep.mubr.msk.bf16.mxu0 %vm394_vm0, %v1741_v28  ;;  %1698 = vmatprep.mubr.msk.bf16.mxu1 %vm394_vm0, %v1742_v29 }
  0x3e   :  { %1667 = vmatmul.mubr.msk.bf16.gmra.mrb[24].mxu0 %vm394_vm0, %v1743_v30  ;;  %1699 = vmatmul.mubr.msk.bf16.gmra.mrb[24].mxu1 %vm394_vm0, %v1744_v31  ;;  %v1457_v31 = vunpack.c.h.bf16 %v1572_v5 }
  0x3f   :  { %1670 = vmatprep.mubr.msk.bf16.mxu0 %vm394_vm0, %v1745_v32  ;;  %1702 = vmatprep.mubr.msk.bf16.mxu1 %vm394_vm0, %v1746_v33  ;;  %v1521_v32 = vunpack.c.h.bf16 %v1588_v6 }
  0x46   :  { %1671 = vmatmul.mubr.msk.bf16.gmra.mrb[28].mxu0 %vm394_vm0, %v1747_v34  ;;  %1703 = vmatmul.mubr.msk.bf16.gmra.mrb[28].mxu1 %vm394_vm0, %v1748_v35 }
  0xe1   :  { %v1644_v43 = vpop.f32.mrb[0].mxu0  ;;  %v1676_v44 = vpop.f32.mrb[0].mxu1 }
  0xe2   :  { %v988_v47 = vadd.f32 %v1644_v43, %v1926_v40  ;;  %v1020_v48 = vadd.f32 %v1676_v44, %v1926_v40  ;;  %v529_v49 = vpop.f32.mrb[1].mxu0  ;;  %v657_v50 = vpop.f32.mrb[1].mxu1 }
  0xe3   :  { %v986_v53 = vadd.f32 %v1926_v40, %v529_v49  ;;  %v1018_v54 = vadd.f32 %v1926_v40, %v657_v50  ;;  %v1645_v55 = vpop.f32.mrb[2].mxu0  ;;  %v1677_v56 = vpop.f32.mrb[2].mxu1  ;;  %v1574_v50 = vld [vmem:[%s2270_s3 + $0x28] sm:$0xff]  }
  0xe4   :  { %v1180_v59 = vadd.f32 %v1448_v41, %v988_v47  ;;  %v1212_v60 = vadd.f32 %v1512_v42, %v1020_v48  ;;  %v989_v61 = vadd.f32 %v1645_v55, %v1926_v40  ;;  %v1021_v62 = vadd.f32 %v1677_v56, %v1926_v40  ;;  %v532_v63 = vpop.f32.mrb[3].mxu0  ;;  %v660_v0 = vpop.f32.mrb[3].mxu1  ;;  %v1573_v56 = vld [vmem:[%s2270_s3 + $0x20] sm:$0xff]  }
  0xe5   :  { %v1178_v1 = vadd.f32 %v1444_v45, %v986_v53  ;;  %v1210_v2 = vadd.f32 %v1508_v46, %v1018_v54  ;;  %v987_v3 = vadd.f32 %v1926_v40, %v532_v63  ;;  %v1019_v4 = vadd.f32 %v1926_v40, %v660_v0 }
  0xe6   :  { %v1244_v7 = vmax.f32 %v1180_v59, 0.0  ;;  %v1276_v8 = vmax.f32 %v1212_v60, 0.0  ;;  %v1181_v9 = vadd.f32 %v1449_v51, %v989_v61  ;;  %v1213_v10 = vadd.f32 %v1513_v52, %v1021_v62  ;;  %v1590_v51 = vld [vmem:[%s2270_s3 + $0xa8] sm:$0xff]  }
  0xe7   :  { %v1242_v13 = vmax.f32 %v1178_v1, 0.0  ;;  %v1274_v14 = vmax.f32 %v1210_v2, 0.0  ;;  %v1179_v15 = vadd.f32 %v1445_v57, %v987_v3  ;;  %v1211_v16 = vadd.f32 %v1509_v58, %v1019_v4  ;;  %v1589_v57 = vld [vmem:[%s2270_s3 + $0xa0] sm:$0xff]  }
  0xe8   :  { %1308 = vst [vmem:[%s2272_s4 + $0x10] sm:$0xff] %v1244_v7  ;;  %1340 = vst [vmem:[%s2272_s4 + $0x110] sm:$0xff] %v1276_v8  ;;  %v1245_v17 = vmax.f32 %v1181_v9, 0.0  ;;  %v1277_v18 = vmax.f32 %v1213_v10, 0.0  ;;  %v1464_v0 = vunpack.c.l.bf16 %v1574_v50  ;;  %v1528_v1 = vunpack.c.l.bf16 %v1590_v51 }
  0xe9   :  { %1306 = vst [vmem:[%s2272_s4] sm:$0xff] %v1242_v13  ;;  %1338 = vst [vmem:[%s2272_s4 + $0x100] sm:$0xff] %v1274_v14  ;;  %v1243_v21 = vmax.f32 %v1179_v15, 0.0  ;;  %v1275_v22 = vmax.f32 %v1211_v16, 0.0  ;;  %v1648_v23 = vpop.f32.mrb[4].mxu0  ;;  %v1680_v24 = vpop.f32.mrb[4].mxu1  ;;  %v1460_v6 = vunpack.c.l.bf16 %v1573_v56  ;;  %v1524_v7 = vunpack.c.l.bf16 %v1589_v57 }
  0xea   :  { %1309 = vst [vmem:[%s2272_s4 + $0x18] sm:$0xff] %v1245_v17  ;;  %1341 = vst [vmem:[%s2272_s4 + $0x118] sm:$0xff] %v1277_v18  ;;  %v992_v27 = vadd.f32 %v1648_v23, %v1926_v40  ;;  %v1024_v28 = vadd.f32 %v1680_v24, %v1926_v40  ;;  %v545_v29 = vpop.f32.mrb[5].mxu0  ;;  %v673_v30 = vpop.f32.mrb[5].mxu1  ;;  %v1465_v12 = vunpack.c.h.bf16 %v1574_v50  ;;  %v1529_v13 = vunpack.c.h.bf16 %v1590_v51 }
  0xeb   :  { %1307 = vst [vmem:[%s2272_s4 + $0x8] sm:$0xff] %v1243_v21  ;;  %1339 = vst [vmem:[%s2272_s4 + $0x108] sm:$0xff] %v1275_v22  ;;  %v990_v33 = vadd.f32 %v1926_v40, %v545_v29  ;;  %v1022_v34 = vadd.f32 %v1926_v40, %v673_v30  ;;  %v1649_v35 = vpop.f32.mrb[6].mxu0  ;;  %v1681_v36 = vpop.f32.mrb[6].mxu1  ;;  %v1461_v18 = vunpack.c.h.bf16 %v1573_v56  ;;  %v1576_v30 = vld [vmem:[%s2270_s3 + $0x38] sm:$0xff]  }
  0xec   :  { %v1184_v39 = vadd.f32 %v1456_v19, %v992_v27  ;;  %v1216_v41 = vadd.f32 %v1520_v20, %v1024_v28  ;;  %v993_v42 = vadd.f32 %v1649_v35, %v1926_v40  ;;  %v1025_v43 = vadd.f32 %v1681_v36, %v1926_v40  ;;  %v548_v44 = vpop.f32.mrb[7].mxu0  ;;  %v676_v45 = vpop.f32.mrb[7].mxu1  ;;  %v1575_v36 = vld [vmem:[%s2270_s3 + $0x30] sm:$0xff]  }
  0xed   :  { %v1182_v46 = vadd.f32 %v1452_v25, %v990_v33  ;;  %v1214_v47 = vadd.f32 %v1516_v26, %v1022_v34  ;;  %v991_v48 = vadd.f32 %v1926_v40, %v548_v44  ;;  %v1023_v49 = vadd.f32 %v1926_v40, %v676_v45 }
  0xee   :  { %v1248_v52 = vmax.f32 %v1184_v39, 0.0  ;;  %v1280_v53 = vmax.f32 %v1216_v41, 0.0  ;;  %v1185_v54 = vadd.f32 %v1457_v31, %v993_v42  ;;  %v1217_v55 = vadd.f32 %v1521_v32, %v1025_v43  ;;  %v1592_v31 = vld [vmem:[%s2270_s3 + $0xb8] sm:$0xff]  }
  0xef   :  { %v1246_v58 = vmax.f32 %v1182_v46, 0.0  ;;  %v1278_v59 = vmax.f32 %v1214_v47, 0.0  ;;  %v1183_v60 = vadd.f32 %v1453_v37, %v991_v48  ;;  %v1215_v61 = vadd.f32 %v1517_v38, %v1023_v49  ;;  %v1591_v37 = vld [vmem:[%s2270_s3 + $0xb0] sm:$0xff]  }
  0xf0   :  { %1312 = vst [vmem:[%s2272_s4 + $0x30] sm:$0xff] %v1248_v52  ;;  %1344 = vst [vmem:[%s2272_s4 + $0x130] sm:$0xff] %v1280_v53  ;;  %v1249_v62 = vmax.f32 %v1185_v54, 0.0  ;;  %v1281_v63 = vmax.f32 %v1217_v55, 0.0  ;;  %v1525_v19 = vunpack.c.h.bf16 %v1589_v57  ;;  %v1472_v45 = vunpack.c.l.bf16 %v1576_v30 }
  0xf1   :  { %1310 = vst [vmem:[%s2272_s4 + $0x20] sm:$0xff] %v1246_v58  ;;  %1342 = vst [vmem:[%s2272_s4 + $0x120] sm:$0xff] %v1278_v59  ;;  %v1247_v2 = vmax.f32 %v1183_v60, 0.0  ;;  %v1279_v3 = vmax.f32 %v1215_v61, 0.0  ;;  %v1652_v4 = vpop.f32.mrb[8].mxu0  ;;  %v1684_v5 = vpop.f32.mrb[8].mxu1  ;;  %v1536_v46 = vunpack.c.l.bf16 %v1592_v31  ;;  %v1468_v51 = vunpack.c.l.bf16 %v1575_v36 }
  0xf2   :  { %1313 = vst [vmem:[%s2272_s4 + $0x38] sm:$0xff] %v1249_v62  ;;  %1345 = vst [vmem:[%s2272_s4 + $0x138] sm:$0xff] %v1281_v63  ;;  %v996_v8 = vadd.f32 %v1652_v4, %v1926_v40  ;;  %v1028_v9 = vadd.f32 %v1684_v5, %v1926_v40  ;;  %v561_v10 = vpop.f32.mrb[9].mxu0  ;;  %v689_v11 = vpop.f32.mrb[9].mxu1  ;;  %v1532_v52 = vunpack.c.l.bf16 %v1591_v37  ;;  %v1473_v57 = vunpack.c.h.bf16 %v1576_v30 }
  0xf3   :  { %1311 = vst [vmem:[%s2272_s4 + $0x28] sm:$0xff] %v1247_v2  ;;  %1343 = vst [vmem:[%s2272_s4 + $0x128] sm:$0xff] %v1279_v3  ;;  %v994_v14 = vadd.f32 %v1926_v40, %v561_v10  ;;  %v1026_v15 = vadd.f32 %v1926_v40, %v689_v11  ;;  %v1653_v16 = vpop.f32.mrb[10].mxu0  ;;  %v1685_v17 = vpop.f32.mrb[10].mxu1  ;;  %v1537_v58 = vunpack.c.h.bf16 %v1592_v31  ;;  %v1469_v63 = vunpack.c.h.bf16 %v1575_v36  ;;  %v1578_v11 = vld [vmem:[%s2270_s3 + $0x48] sm:$0xff]  }
  0xf4   :  { %v1188_v20 = vadd.f32 %v1464_v0, %v996_v8  ;;  %v1220_v21 = vadd.f32 %v1528_v1, %v1028_v9  ;;  %v997_v22 = vadd.f32 %v1653_v16, %v1926_v40  ;;  %v1029_v23 = vadd.f32 %v1685_v17, %v1926_v40  ;;  %v564_v24 = vpop.f32.mrb[11].mxu0  ;;  %v692_v25 = vpop.f32.mrb[11].mxu1  ;;  %v1577_v17 = vld [vmem:[%s2270_s3 + $0x40] sm:$0xff]  }
  0xf5   :  { %v1186_v26 = vadd.f32 %v1460_v6, %v994_v14  ;;  %v1218_v27 = vadd.f32 %v1524_v7, %v1026_v15  ;;  %v995_v28 = vadd.f32 %v1926_v40, %v564_v24  ;;  %v1027_v29 = vadd.f32 %v1926_v40, %v692_v25 }
  0xf6   :  { %v1252_v32 = vmax.f32 %v1188_v20, 0.0  ;;  %v1284_v33 = vmax.f32 %v1220_v21, 0.0  ;;  %v1189_v34 = vadd.f32 %v1465_v12, %v997_v22  ;;  %v1221_v35 = vadd.f32 %v1529_v13, %v1029_v23  ;;  %v1594_v12 = vld [vmem:[%s2270_s3 + $0xc8] sm:$0xff]  }
  0xf7   :  { %v1250_v38 = vmax.f32 %v1186_v26, 0.0  ;;  %v1282_v39 = vmax.f32 %v1218_v27, 0.0  ;;  %v1187_v41 = vadd.f32 %v1461_v18, %v995_v28  ;;  %v1219_v42 = vadd.f32 %v1525_v19, %v1027_v29  ;;  %v1593_v18 = vld [vmem:[%s2270_s3 + $0xc0] sm:$0xff]  }
  0xf8   :  { %1316 = vst [vmem:[%s2272_s4 + $0x50] sm:$0xff] %v1252_v32  ;;  %1348 = vst [vmem:[%s2272_s4 + $0x150] sm:$0xff] %v1284_v33  ;;  %v1253_v43 = vmax.f32 %v1189_v34, 0.0  ;;  %v1285_v44 = vmax.f32 %v1221_v35, 0.0  ;;  %v1533_v0 = vunpack.c.h.bf16 %v1591_v37  ;;  %v1480_v25 = vunpack.c.l.bf16 %v1578_v11 }
  0xf9   :  { %1314 = vst [vmem:[%s2272_s4 + $0x40] sm:$0xff] %v1250_v38  ;;  %1346 = vst [vmem:[%s2272_s4 + $0x140] sm:$0xff] %v1282_v39  ;;  %v1251_v47 = vmax.f32 %v1187_v41, 0.0  ;;  %v1283_v48 = vmax.f32 %v1219_v42, 0.0  ;;  %v1656_v49 = vpop.f32.mrb[12].mxu0  ;;  %v1688_v50 = vpop.f32.mrb[12].mxu1  ;;  %v1544_v26 = vunpack.c.l.bf16 %v1594_v12  ;;  %v1476_v31 = vunpack.c.l.bf16 %v1577_v17 }
  0xfa   :  { %1317 = vst [vmem:[%s2272_s4 + $0x58] sm:$0xff] %v1253_v43  ;;  %1349 = vst [vmem:[%s2272_s4 + $0x158] sm:$0xff] %v1285_v44  ;;  %v1000_v53 = vadd.f32 %v1656_v49, %v1926_v40  ;;  %v1032_v54 = vadd.f32 %v1688_v50, %v1926_v40  ;;  %v577_v55 = vpop.f32.mrb[13].mxu0  ;;  %v705_v56 = vpop.f32.mrb[13].mxu1  ;;  %v1540_v32 = vunpack.c.l.bf16 %v1593_v18  ;;  %v1481_v37 = vunpack.c.h.bf16 %v1578_v11 }
  0xfb   :  { %1315 = vst [vmem:[%s2272_s4 + $0x48] sm:$0xff] %v1251_v47  ;;  %1347 = vst [vmem:[%s2272_s4 + $0x148] sm:$0xff] %v1283_v48  ;;  %v998_v59 = vadd.f32 %v1926_v40, %v577_v55  ;;  %v1030_v60 = vadd.f32 %v1926_v40, %v705_v56  ;;  %v1657_v61 = vpop.f32.mrb[14].mxu0  ;;  %v1689_v62 = vpop.f32.mrb[14].mxu1  ;;  %v1545_v38 = vunpack.c.h.bf16 %v1594_v12  ;;  %v1477_v44 = vunpack.c.h.bf16 %v1577_v17  ;;  %v1580_v56 = vld [vmem:[%s2270_s3 + $0x58] sm:$0xff]  }
  0xfc   :  { %v1192_v1 = vadd.f32 %v1472_v45, %v1000_v53  ;;  %v1224_v2 = vadd.f32 %v1536_v46, %v1032_v54  ;;  %v1001_v3 = vadd.f32 %v1657_v61, %v1926_v40  ;;  %v1033_v4 = vadd.f32 %v1689_v62, %v1926_v40  ;;  %v580_v5 = vpop.f32.mrb[15].mxu0  ;;  %v708_v6 = vpop.f32.mrb[15].mxu1  ;;  %v1579_v62 = vld [vmem:[%s2270_s3 + $0x50] sm:$0xff]  }
  0xfd   :  { %v1190_v7 = vadd.f32 %v1468_v51, %v998_v59  ;;  %v1222_v8 = vadd.f32 %v1532_v52, %v1030_v60  ;;  %v999_v9 = vadd.f32 %v1926_v40, %v580_v5  ;;  %v1031_v10 = vadd.f32 %v1926_v40, %v708_v6 }
  0xfe   :  { %v1256_v13 = vmax.f32 %v1192_v1, 0.0  ;;  %v1288_v14 = vmax.f32 %v1224_v2, 0.0  ;;  %v1193_v15 = vadd.f32 %v1473_v57, %v1001_v3  ;;  %v1225_v16 = vadd.f32 %v1537_v58, %v1033_v4  ;;  %v1596_v57 = vld [vmem:[%s2270_s3 + $0xd8] sm:$0xff]  }
  0xff   :  { %v1254_v19 = vmax.f32 %v1190_v7, 0.0  ;;  %v1286_v20 = vmax.f32 %v1222_v8, 0.0  ;;  %v1191_v21 = vadd.f32 %v1469_v63, %v999_v9  ;;  %v1223_v22 = vadd.f32 %v1533_v0, %v1031_v10  ;;  %v1595_v63 = vld [vmem:[%s2270_s3 + $0xd0] sm:$0xff]  }
 0x100   :  { %1320 = vst [vmem:[%s2272_s4 + $0x70] sm:$0xff] %v1256_v13  ;;  %1352 = vst [vmem:[%s2272_s4 + $0x170] sm:$0xff] %v1288_v14  ;;  %v1257_v23 = vmax.f32 %v1193_v15, 0.0  ;;  %v1289_v24 = vmax.f32 %v1225_v16, 0.0  ;;  %v1541_v45 = vunpack.c.h.bf16 %v1593_v18  ;;  %v1488_v6 = vunpack.c.l.bf16 %v1580_v56 }
 0x101   :  { %1318 = vst [vmem:[%s2272_s4 + $0x60] sm:$0xff] %v1254_v19  ;;  %1350 = vst [vmem:[%s2272_s4 + $0x160] sm:$0xff] %v1286_v20  ;;  %v1255_v27 = vmax.f32 %v1191_v21, 0.0  ;;  %v1287_v28 = vmax.f32 %v1223_v22, 0.0  ;;  %v1660_v29 = vpop.f32.mrb[16].mxu0  ;;  %v1692_v30 = vpop.f32.mrb[16].mxu1  ;;  %v1552_v7 = vunpack.c.l.bf16 %v1596_v57  ;;  %v1484_v12 = vunpack.c.l.bf16 %v1579_v62 }
 0x102   :  { %1321 = vst [vmem:[%s2272_s4 + $0x78] sm:$0xff] %v1257_v23  ;;  %1353 = vst [vmem:[%s2272_s4 + $0x178] sm:$0xff] %v1289_v24  ;;  %v1004_v33 = vadd.f32 %v1660_v29, %v1926_v40  ;;  %v1036_v34 = vadd.f32 %v1692_v30, %v1926_v40  ;;  %v593_v35 = vpop.f32.mrb[17].mxu0  ;;  %v721_v36 = vpop.f32.mrb[17].mxu1  ;;  %v1548_v13 = vunpack.c.l.bf16 %v1595_v63  ;;  %v1489_v18 = vunpack.c.h.bf16 %v1580_v56 }
 0x103   :  { %1319 = vst [vmem:[%s2272_s4 + $0x68] sm:$0xff] %v1255_v27  ;;  %1351 = vst [vmem:[%s2272_s4 + $0x168] sm:$0xff] %v1287_v28  ;;  %v1002_v39 = vadd.f32 %v1926_v40, %v593_v35  ;;  %v1034_v41 = vadd.f32 %v1926_v40, %v721_v36  ;;  %v1661_v42 = vpop.f32.mrb[18].mxu0  ;;  %v1693_v43 = vpop.f32.mrb[18].mxu1  ;;  %v1553_v19 = vunpack.c.h.bf16 %v1596_v57  ;;  %v1485_v24 = vunpack.c.h.bf16 %v1579_v62  ;;  %v1582_v36 = vld [vmem:[%s2270_s3 + $0x68] sm:$0xff]  }
 0x104   :  { %v1196_v46 = vadd.f32 %v1480_v25, %v1004_v33  ;;  %v1228_v47 = vadd.f32 %v1544_v26, %v1036_v34  ;;  %v1005_v48 = vadd.f32 %v1661_v42, %v1926_v40  ;;  %v1037_v49 = vadd.f32 %v1693_v43, %v1926_v40  ;;  %v596_v50 = vpop.f32.mrb[19].mxu0  ;;  %v724_v51 = vpop.f32.mrb[19].mxu1  ;;  %v1581_v43 = vld [vmem:[%s2270_s3 + $0x60] sm:$0xff]  }
 0x105   :  { %v1194_v52 = vadd.f32 %v1476_v31, %v1002_v39  ;;  %v1226_v53 = vadd.f32 %v1540_v32, %v1034_v41  ;;  %v1003_v54 = vadd.f32 %v1926_v40, %v596_v50  ;;  %v1035_v55 = vadd.f32 %v1926_v40, %v724_v51 }
 0x106   :  { %v1260_v58 = vmax.f32 %v1196_v46, 0.0  ;;  %v1292_v59 = vmax.f32 %v1228_v47, 0.0  ;;  %v1197_v60 = vadd.f32 %v1481_v37, %v1005_v48  ;;  %v1229_v61 = vadd.f32 %v1545_v38, %v1037_v49  ;;  %v1598_v37 = vld [vmem:[%s2270_s3 + $0xe8] sm:$0xff]  }
 0x107   :  { %v1258_v0 = vmax.f32 %v1194_v52, 0.0  ;;  %v1290_v1 = vmax.f32 %v1226_v53, 0.0  ;;  %v1195_v2 = vadd.f32 %v1477_v44, %v1003_v54  ;;  %v1227_v3 = vadd.f32 %v1541_v45, %v1035_v55  ;;  %v1597_v44 = vld [vmem:[%s2270_s3 + $0xe0] sm:$0xff]  }
 0x108   :  { %1324 = vst [vmem:[%s2272_s4 + $0x90] sm:$0xff] %v1260_v58  ;;  %1356 = vst [vmem:[%s2272_s4 + $0x190] sm:$0xff] %v1292_v59  ;;  %v1261_v4 = vmax.f32 %v1197_v60, 0.0  ;;  %v1293_v5 = vmax.f32 %v1229_v61, 0.0  ;;  %v1549_v25 = vunpack.c.h.bf16 %v1595_v63  ;;  %v1496_v51 = vunpack.c.l.bf16 %v1582_v36 }
 0x109   :  { %1322 = vst [vmem:[%s2272_s4 + $0x80] sm:$0xff] %v1258_v0  ;;  %1354 = vst [vmem:[%s2272_s4 + $0x180] sm:$0xff] %v1290_v1  ;;  %v1259_v8 = vmax.f32 %v1195_v2, 0.0  ;;  %v1291_v9 = vmax.f32 %v1227_v3, 0.0  ;;  %v1664_v10 = vpop.f32.mrb[20].mxu0  ;;  %v1696_v11 = vpop.f32.mrb[20].mxu1  ;;  %v1560_v52 = vunpack.c.l.bf16 %v1598_v37  ;;  %v1492_v57 = vunpack.c.l.bf16 %v1581_v43 }
 0x10a   :  { %1325 = vst [vmem:[%s2272_s4 + $0x98] sm:$0xff] %v1261_v4  ;;  %1357 = vst [vmem:[%s2272_s4 + $0x198] sm:$0xff] %v1293_v5  ;;  %v1008_v14 = vadd.f32 %v1664_v10, %v1926_v40  ;;  %v1040_v15 = vadd.f32 %v1696_v11, %v1926_v40  ;;  %v609_v16 = vpop.f32.mrb[21].mxu0  ;;  %v737_v17 = vpop.f32.mrb[21].mxu1  ;;  %v1556_v58 = vunpack.c.l.bf16 %v1597_v44  ;;  %v1497_v63 = vunpack.c.h.bf16 %v1582_v36 }
 0x10b   :  { %1323 = vst [vmem:[%s2272_s4 + $0x88] sm:$0xff] %v1259_v8  ;;  %1355 = vst [vmem:[%s2272_s4 + $0x188] sm:$0xff] %v1291_v9  ;;  %v1006_v20 = vadd.f32 %v1926_v40, %v609_v16  ;;  %v1038_v21 = vadd.f32 %v1926_v40, %v737_v17  ;;  %v1665_v22 = vpop.f32.mrb[22].mxu0  ;;  %v1697_v23 = vpop.f32.mrb[22].mxu1  ;;  %v1561_v0 = vunpack.c.h.bf16 %v1598_v37  ;;  %v1493_v5 = vunpack.c.h.bf16 %v1581_v43  ;;  %v1584_v17 = vld [vmem:[%s2270_s3 + $0x78] sm:$0xff]  }
 0x10c   :  { %v1200_v26 = vadd.f32 %v1488_v6, %v1008_v14  ;;  %v1232_v27 = vadd.f32 %v1552_v7, %v1040_v15  ;;  %v1009_v28 = vadd.f32 %v1665_v22, %v1926_v40  ;;  %v1041_v29 = vadd.f32 %v1697_v23, %v1926_v40  ;;  %v612_v30 = vpop.f32.mrb[23].mxu0  ;;  %v740_v31 = vpop.f32.mrb[23].mxu1  ;;  %v1583_v23 = vld [vmem:[%s2270_s3 + $0x70] sm:$0xff]  }
 0x10d   :  { %v1198_v32 = vadd.f32 %v1484_v12, %v1006_v20  ;;  %v1230_v33 = vadd.f32 %v1548_v13, %v1038_v21  ;;  %v1007_v34 = vadd.f32 %v1926_v40, %v612_v30  ;;  %v1039_v35 = vadd.f32 %v1926_v40, %v740_v31 }
 0x10e   :  { %v1264_v38 = vmax.f32 %v1200_v26, 0.0  ;;  %v1296_v39 = vmax.f32 %v1232_v27, 0.0  ;;  %v1201_v41 = vadd.f32 %v1489_v18, %v1009_v28  ;;  %v1233_v42 = vadd.f32 %v1553_v19, %v1041_v29  ;;  %v1600_v18 = vld [vmem:[%s2270_s3 + $0xf8] sm:$0xff]  }
 0x10f   :  { %v1262_v45 = vmax.f32 %v1198_v32, 0.0  ;;  %v1294_v46 = vmax.f32 %v1230_v33, 0.0  ;;  %v1199_v47 = vadd.f32 %v1485_v24, %v1007_v34  ;;  %v1231_v48 = vadd.f32 %v1549_v25, %v1039_v35  ;;  %v1599_v24 = vld [vmem:[%s2270_s3 + $0xf0] sm:$0xff]  }
 0x110   :  { %1328 = vst [vmem:[%s2272_s4 + $0xb0] sm:$0xff] %v1264_v38  ;;  %1360 = vst [vmem:[%s2272_s4 + $0x1b0] sm:$0xff] %v1296_v39  ;;  %v1265_v49 = vmax.f32 %v1201_v41, 0.0  ;;  %v1297_v50 = vmax.f32 %v1233_v42, 0.0  ;;  %v1557_v6 = vunpack.c.h.bf16 %v1597_v44  ;;  %v1504_v31 = vunpack.c.l.bf16 %v1584_v17 }
 0x111   :  { %1326 = vst [vmem:[%s2272_s4 + $0xa0] sm:$0xff] %v1262_v45  ;;  %1358 = vst [vmem:[%s2272_s4 + $0x1a0] sm:$0xff] %v1294_v46  ;;  %v1263_v53 = vmax.f32 %v1199_v47, 0.0  ;;  %v1295_v54 = vmax.f32 %v1231_v48, 0.0  ;;  %v1668_v55 = vpop.f32.mrb[24].mxu0  ;;  %v1700_v56 = vpop.f32.mrb[24].mxu1  ;;  %v1568_v32 = vunpack.c.l.bf16 %v1600_v18  ;;  %v1500_v37 = vunpack.c.l.bf16 %v1583_v23 }
 0x112   :  { %1329 = vst [vmem:[%s2272_s4 + $0xb8] sm:$0xff] %v1265_v49  ;;  %1361 = vst [vmem:[%s2272_s4 + $0x1b8] sm:$0xff] %v1297_v50  ;;  %v1012_v59 = vadd.f32 %v1668_v55, %v1926_v40  ;;  %v1044_v60 = vadd.f32 %v1700_v56, %v1926_v40  ;;  %v625_v61 = vpop.f32.mrb[25].mxu0  ;;  %v753_v62 = vpop.f32.mrb[25].mxu1  ;;  %v1564_v38 = vunpack.c.l.bf16 %v1599_v24  ;;  %v1505_v44 = vunpack.c.h.bf16 %v1584_v17 }
 0x113   :  { %1327 = vst [vmem:[%s2272_s4 + $0xa8] sm:$0xff] %v1263_v53  ;;  %1359 = vst [vmem:[%s2272_s4 + $0x1a8] sm:$0xff] %v1295_v54  ;;  %v1010_v1 = vadd.f32 %v1926_v40, %v625_v61  ;;  %v1042_v2 = vadd.f32 %v1926_v40, %v753_v62  ;;  %v1669_v3 = vpop.f32.mrb[26].mxu0  ;;  %v1701_v4 = vpop.f32.mrb[26].mxu1  ;;  %v1569_v45 = vunpack.c.h.bf16 %v1600_v18  ;;  %v1501_v50 = vunpack.c.h.bf16 %v1583_v23 }
 0x114   :  { %v1204_v7 = vadd.f32 %v1496_v51, %v1012_v59  ;;  %v1236_v8 = vadd.f32 %v1560_v52, %v1044_v60  ;;  %v1013_v9 = vadd.f32 %v1669_v3, %v1926_v40  ;;  %v1045_v10 = vadd.f32 %v1701_v4, %v1926_v40  ;;  %v628_v11 = vpop.f32.mrb[27].mxu0  ;;  %v756_v12 = vpop.f32.mrb[27].mxu1 }
 0x115   :  { %v1202_v13 = vadd.f32 %v1492_v57, %v1010_v1  ;;  %v1234_v14 = vadd.f32 %v1556_v58, %v1042_v2  ;;  %v1011_v15 = vadd.f32 %v1926_v40, %v628_v11  ;;  %v1043_v16 = vadd.f32 %v1926_v40, %v756_v12 }
 0x116   :  { %v1268_v19 = vmax.f32 %v1204_v7, 0.0  ;;  %v1300_v20 = vmax.f32 %v1236_v8, 0.0  ;;  %v1205_v21 = vadd.f32 %v1497_v63, %v1013_v9  ;;  %v1237_v22 = vadd.f32 %v1561_v0, %v1045_v10 }
 0x117   :  { %v1266_v25 = vmax.f32 %v1202_v13, 0.0  ;;  %v1298_v26 = vmax.f32 %v1234_v14, 0.0  ;;  %v1203_v27 = vadd.f32 %v1493_v5, %v1011_v15  ;;  %v1235_v28 = vadd.f32 %v1557_v6, %v1043_v16 }
 0x118   :  { %1332 = vst [vmem:[%s2272_s4 + $0xd0] sm:$0xff] %v1268_v19  ;;  %1364 = vst [vmem:[%s2272_s4 + $0x1d0] sm:$0xff] %v1300_v20  ;;  %v1269_v29 = vmax.f32 %v1205_v21, 0.0  ;;  %v1301_v30 = vmax.f32 %v1237_v22, 0.0  ;;  %v1565_v51 = vunpack.c.h.bf16 %v1599_v24 }
 0x119   :  { %1330 = vst [vmem:[%s2272_s4 + $0xc0] sm:$0xff] %v1266_v25  ;;  %1362 = vst [vmem:[%s2272_s4 + $0x1c0] sm:$0xff] %v1298_v26  ;;  %v1267_v33 = vmax.f32 %v1203_v27, 0.0  ;;  %v1299_v34 = vmax.f32 %v1235_v28, 0.0  ;;  %v1672_v35 = vpop.f32.mrb[28].mxu0  ;;  %v1704_v36 = vpop.f32.mrb[28].mxu1 }
 0x11a   :  { %1333 = vst [vmem:[%s2272_s4 + $0xd8] sm:$0xff] %v1269_v29  ;;  %1365 = vst [vmem:[%s2272_s4 + $0x1d8] sm:$0xff] %v1301_v30  ;;  %v1016_v39 = vadd.f32 %v1672_v35, %v1926_v40  ;;  %v1048_v41 = vadd.f32 %v1704_v36, %v1926_v40  ;;  %v641_v42 = vpop.f32.mrb[29].mxu0  ;;  %v769_v43 = vpop.f32.mrb[29].mxu1 }
 0x11b   :  { %1331 = vst [vmem:[%s2272_s4 + $0xc8] sm:$0xff] %v1267_v33  ;;  %1363 = vst [vmem:[%s2272_s4 + $0x1c8] sm:$0xff] %v1299_v34  ;;  %v1014_v46 = vadd.f32 %v1926_v40, %v641_v42  ;;  %v1046_v47 = vadd.f32 %v1926_v40, %v769_v43  ;;  %v1673_v48 = vpop.f32.mrb[30].mxu0  ;;  %v1705_v49 = vpop.f32.mrb[30].mxu1 }
 0x11c   :  { %v1208_v52 = vadd.f32 %v1504_v31, %v1016_v39  ;;  %v1240_v53 = vadd.f32 %v1568_v32, %v1048_v41  ;;  %v1017_v54 = vadd.f32 %v1673_v48, %v1926_v40  ;;  %v1049_v55 = vadd.f32 %v1705_v49, %v1926_v40  ;;  %v644_v56 = vpop.f32.mrb[31].mxu0  ;;  %v772_v57 = vpop.f32.mrb[31].mxu1 }
 0x11d   :  { %v1206_v58 = vadd.f32 %v1500_v37, %v1014_v46  ;;  %v1238_v59 = vadd.f32 %v1564_v38, %v1046_v47  ;;  %v1015_v60 = vadd.f32 %v1926_v40, %v644_v56  ;;  %v1047_v61 = vadd.f32 %v1926_v40, %v772_v57 }
 0x11e   :  { %v1272_v62 = vmax.f32 %v1208_v52, 0.0  ;;  %v1304_v63 = vmax.f32 %v1240_v53, 0.0  ;;  %v1209_v0 = vadd.f32 %v1505_v44, %v1017_v54  ;;  %v1241_v1 = vadd.f32 %v1569_v45, %v1049_v55 }
 0x11f   :  { %v1270_v2 = vmax.f32 %v1206_v58, 0.0  ;;  %v1302_v3 = vmax.f32 %v1238_v59, 0.0  ;;  %v1207_v4 = vadd.f32 %v1501_v50, %v1015_v60  ;;  %v1239_v5 = vadd.f32 %v1565_v51, %v1047_v61 }
 0x120   :  { %1336 = vst [vmem:[%s2272_s4 + $0xf0] sm:$0xff] %v1272_v62  ;;  %1368 = vst [vmem:[%s2272_s4 + $0x1f0] sm:$0xff] %v1304_v63  ;;  %v1273_v6 = vmax.f32 %v1209_v0, 0.0  ;;  %v1305_v7 = vmax.f32 %v1241_v1, 0.0 }
 0x121   :  { %1334 = vst [vmem:[%s2272_s4 + $0xe0] sm:$0xff] %v1270_v2  ;;  %1366 = vst [vmem:[%s2272_s4 + $0x1e0] sm:$0xff] %v1302_v3  ;;  %v1271_v40 = vmax.f32 %v1207_v4, 0.0  ;;  %v1303_v8 = vmax.f32 %v1239_v5, 0.0 }
 0x122   :  { %1337 = vst [vmem:[%s2272_s4 + $0xf8] sm:$0xff] %v1273_v6  ;;  %1369 = vst [vmem:[%s2272_s4 + $0x1f8] sm:$0xff] %v1305_v7 }
 0x123   :  { %1335 = vst [vmem:[%s2272_s4 + $0xe8] sm:$0xff] %v1271_v40  ;;  %1367 = vst [vmem:[%s2272_s4 + $0x1e8] sm:$0xff] %v1303_v8 }

</bundles_post_ra>
